<compile_context>
chip_gen: v7x
topology: tpu7x:2x2x1
jax: 0.10.0
libtpu: 0.0.40
codegen_flags: <defaults>
</compile_context>

<pallas_src>
import functools
from dataclasses import dataclass

import jax
import jax.numpy as jnp
from jax.experimental import pallas as pl
from jax.experimental.pallas import tpu as pltpu


# ------------------------------ config ------------------------------------

@dataclass(frozen=True)
class Config:
    hidden_size: int = 32
    lstm_layers: int = 2
    hidden_dropout_prob: float = 0.1
    embed_mode: str = "all"
    max_note_position_embedding: int = 16
    max_chunk_position_embedding: int = 16
    layer_norm_eps: float = 1e-12
    initializer_range: float = 0.02


_VMEM_SPEC = pl.BlockSpec(memory_space=pltpu.MemorySpace.VMEM)

# PyTorch LSTM stores gates as (i, f, g, o); we repack to (i, f, o, g) so one
# contiguous sigmoid covers gate lanes [0 : 3*2hh) and a single tanh covers the rest.
_GATE_ORDER = (0, 1, 3, 2)


# --------------------------- fused Pallas kernel ----------------------------

def _fused_forward_kernel(
        xcat_ref,     # (S*B, H+Nn+Nc)   [inputs | onehot(note) | onehot(chunk)]
        emb_ref,      # (H+Nn+Nc+3, H)   [folded combine weight; combine_b; ln_gamma; ln_beta]
        l1_ref,       # (4HH+1, 16HH)    [Wsame|Wrev ; whh|0 ; bias|0]  BiLSTM layer 1
        l2_ref,       # (4HH+1, 16HH)    BiLSTM layer 2 (reversal-absorbing packing)
        cls_ref,      # (4HH+1, L)       [cls_w(fwd);0 ; 0;cls_w(bwd) ; cls_b]
        pred_ref,     # (B, L)           output = sigmoid(logits)
        y1_scr,       # (S*B, 2HH)       layer-1 output scratch, LOOP order
        *, S, B, HH, DCAT, eps):
    f32 = jnp.float32
    two_hh = 2 * HH           # = hidden_size H
    g8 = 8 * HH               # width of the direction-fused gate block (128 lanes)

    # ---- embedding combine (three matmuls fused into one) + LayerNorm ----
    y = (jnp.dot(xcat_ref[...], emb_ref[0:DCAT, :], preferred_element_type=f32)
         + emb_ref[DCAT:DCAT + 1, :])
    mu = jnp.mean(y, axis=-1, keepdims=True)
    var = jnp.mean((y - mu) ** 2, axis=-1, keepdims=True)
    x0 = ((y - mu) * jax.lax.rsqrt(var + eps)) * emb_ref[DCAT + 1:DCAT + 2, :] \
         + emb_ref[DCAT + 2:DCAT + 3, :]
    # TODO(synk): nn.Dropout layers are identity (eval mode); stochastic dropout not implemented.

    def bilstm(x2d, lref, y_scr):
        """Fused fwd+bwd LSTM over time-major x2d (S*B, 2HH).
        Returns (h at loop step 0, h at loop step S-1), each (B, 2HH) = [h_fwd | h_bwd]."""
        din = two_hh
        # Single hoisted (S*B, 16HH) projection covering BOTH directions.
        p_all = jnp.dot(x2d, lref[0:din, :], preferred_element_type=f32)
        whh = lref[din:din + two_hh, 0:g8]                       # (2HH, 8HH)
        bias = lref[din + two_hh:din + two_hh + 1, 0:g8]         # (1, 8HH)
        p_same = p_all[:, 0:g8] + bias
        p_rev = p_all[:, g8:2 * g8]
        h = jnp.zeros((B, two_hh), f32)                          # [h_fwd | h_bwd]
        c = jnp.zeros((B, two_hh), f32)
        h_first = None
        for s in range(S):                                       # static unroll (S small & fixed)
            r_f = s * B
            r_b = (S - 1 - s) * B
            gates = (p_same[r_f:r_f + B, :] + p_rev[r_b:r_b + B, :]
                     + jnp.dot(h, whh, preferred_element_type=f32))      # (B, 8HH)
            # gate layout [i | f | o | g]: one sigmoid for i,f,o + one tanh for g.
            sfo = jax.nn.sigmoid(gates[:, 0:3 * two_hh])
            g_g = jnp.tanh(gates[:, 3 * two_hh:4 * two_hh])
            i_g = sfo[:, 0:two_hh]
            f_g = sfo[:, two_hh:2 * two_hh]
            o_g = sfo[:, 2 * two_hh:3 * two_hh]
            c = f_g * c + i_g * g_g
            h = o_g * jnp.tanh(c)
            if s == 0:
                h_first = h                                      # holds h_bwd(t = S-1)
            if y_scr is not None:
                # One full-width (B, 2HH) store per step, in LOOP order:
                # row s = [h_fwd(t=s) | h_bwd(t=S-1-s)]; the next layer's packed input
                # weights absorb the backward-half time reversal (no re-alignment needed).
                y_scr[r_f:r_f + B, :] = h
        return h_first, h                                        # h = last loop step

    bilstm(x0, l1_ref, y1_scr)                                   # layer 1 -> scratch
    h2_first, h2_last = bilstm(y1_scr[...], l2_ref, None)        # layer 2 -> registers only
    # TODO(synk): v7x dual-TensorCore split of the two directions deliberately NOT done
    # (per-step work too small to amortize cross-core sync); a parallel batch grid axis
    # is the right lever when many patients are stacked.

    # pooled = lstm_output[:, -1] = [h2_fwd(S-1) | h2_bwd(S-1)] for every batch row.
    # h2_fwd(S-1) lives in h2_last's fwd half, h2_bwd(S-1) in h2_first's bwd half;
    # cls_ref packing zeroes the unwanted halves, so no in-kernel lane concat is needed.
    logits = (jnp.dot(h2_last, cls_ref[0:two_hh, :], preferred_element_type=f32)
              + jnp.dot(h2_first, cls_ref[two_hh:2 * two_hh, :], preferred_element_type=f32)
              + cls_ref[2 * two_hh:2 * two_hh + 1, :])
    pred_ref[...] = jax.nn.sigmoid(logits).astype(pred_ref.dtype)


# ------------------------- weight packing helpers ---------------------------

def _interleave_gates(a_f, a_b, hh):
    """Per-gate column interleave of the two directions in packed gate order
    [i | f | o | g]; within each gate block, cols [0:hh] = fwd, [hh:2hh] = bwd."""
    parts = []
    for k in _GATE_ORDER:
        parts.append(a_f[..., k * hh:(k + 1) * hh])
        parts.append(a_b[..., k * hh:(k + 1) * hh])
    return jnp.concatenate(parts, axis=-1)


def _pack_bilstm_layer(layer_params, hh, rev_input_halves):
    """Pack one bidirectional layer into a single (4hh+1, 16hh) operand:
       rows [0:2hh)   : [W_same | W_rev]  fused input-to-hidden projection
       rows [2hh:4hh) : [whh    | 0   ]   hidden-to-hidden (block-diagonal per direction)
       row  4hh       : [bias   | 0   ]   (b_ih + b_hh, both directions)
    If rev_input_halves, the layer consumes the previous BiLSTM's LOOP-ORDER output
    (row s = [h_fwd(s) | h_bwd(S-1-s)]) and the packing absorbs the time reversal."""
    (w_ih_f, w_hh_f, b_f), (w_ih_b, w_hh_b, b_b) = layer_params
    z_i = jnp.zeros_like(w_ih_f)
    z_h = jnp.zeros_like(w_hh_f)
    if not rev_input_halves:
        w_same = _interleave_gates(w_ih_f, z_i, hh)      # x(t)     -> fwd gate cols
        w_rev = _interleave_gates(z_i, w_ih_b, hh)       # x(S-1-t) -> bwd gate cols
    else:
        zq = jnp.zeros((hh, 4 * hh), w_ih_f.dtype)
        w_same = jnp.concatenate(
            [_interleave_gates(w_ih_f[0:hh], zq, hh),         # fwd-half rows -> fwd cols
             _interleave_gates(zq, w_ih_b[hh:2 * hh], hh)],   # bwd-half rows -> bwd cols
            axis=0)
        w_rev = jnp.concatenate(
            [_interleave_gates(zq, w_ih_b[0:hh], hh),         # fwd-half rows -> bwd cols
             _interleave_gates(w_ih_f[hh:2 * hh], zq, hh)],   # bwd-half rows -> fwd cols
            axis=0)
    wih_fused = jnp.concatenate([w_same, w_rev], axis=-1)                   # (2hh, 16hh)
    whh = jnp.concatenate([_interleave_gates(w_hh_f, z_h, hh),
                           _interleave_gates(z_h, w_hh_b, hh)], axis=0)     # (2hh, 8hh)
    bias = _interleave_gates(b_f, b_b, hh)                                  # (1, 8hh)
    tail = jnp.concatenate([jnp.concatenate([whh, bias], axis=0),
                            jnp.zeros((2 * hh + 1, 8 * hh), jnp.float32)], axis=-1)
    return jnp.concatenate([wih_fused, tail], axis=0)                       # (4hh+1, 16hh)
    # TODO(synk): optional bf16 cast of the packed weights (verify numerics) not applied;
    # kept f32 for exact parity with the float32 reference.


# ------------------------- parameter construction --------------------------

def init_params(key, cfg: Config, num_labels: int):
    h = cfg.hidden_size
    hh = h // 2
    std = cfg.initializer_range
    ks = jax.random.split(key, 5)

    params = {
        "note_emb": std * jax.random.normal(
            ks[0], (cfg.max_note_position_embedding, h), jnp.float32),
        "chunk_emb": std * jax.random.normal(
            ks[1], (cfg.max_chunk_position_embedding, h), jnp.float32),
        "combine_w": std * jax.random.normal(ks[2], (3 * h, h), jnp.float32),
        "combine_b": jnp.zeros((1, h), jnp.float32),
        "ln_gamma": jnp.ones((1, h), jnp.float32),
        "ln_beta": jnp.zeros((1, h), jnp.float32),
        "cls_w": std * jax.random.normal(ks[3], (h, num_labels), jnp.float32),
        "cls_b": jnp.zeros((1, num_labels), jnp.float32),
    }

    # PyTorch LSTM default init: U(-1/sqrt(Hh), 1/sqrt(Hh)); b_ih and b_hh drawn
    # independently and summed.
    bound = 1.0 / (hh ** 0.5)
    lstm = []
    lkeys = jax.random.split(ks[4], cfg.lstm_layers * 2 * 4)
    idx = 0
    for layer in range(cfg.lstm_layers):
        din = h if layer == 0 else 2 * hh
        directions = []
        for _ in range(2):  # forward, backward
            w_ih = jax.random.uniform(lkeys[idx], (din, 4 * hh), jnp.float32, -bound, bound)
            w_hh = jax.random.uniform(lkeys[idx + 1], (hh, 4 * hh), jnp.float32, -bound, bound)
            b_ih = jax.random.uniform(lkeys[idx + 2], (1, 4 * hh), jnp.float32, -bound, bound)
            b_hh = jax.random.uniform(lkeys[idx + 3], (1, 4 * hh), jnp.float32, -bound, bound)
            directions.append((w_ih, w_hh, b_ih + b_hh))
            idx += 4
        lstm.append(tuple(directions))
    params["lstm"] = lstm
    return params


# ------------------------------ forward ------------------------------------

def lstm_layer_forward(params, cfg: Config, inputs, new_note_ids,
                       new_chunk_ids, labels=None):
    """embed_mode='all', eval-mode dropout; single fused Pallas kernel."""
    assert cfg.embed_mode == "all" and cfg.lstm_layers == 2
    b, s, h = inputs.shape
    hh = h // 2
    num_labels = params["cls_w"].shape[1]
    n_note = cfg.max_note_position_embedding
    n_chunk = cfg.max_chunk_position_embedding
    dcat = h + n_note + n_chunk

    # ---- one-shot XLA glue: time-major flatten + one-hots fused into ONE operand.
    # TODO(synk): for throughput, stack many patients so S*B >= 128 rows (adds a parallel
    # grid axis); the example shapes here stay tiny so the kernel is latency-bound.
    x_tm = jnp.transpose(inputs, (1, 0, 2)).reshape(s * b, h)
    ohn = jax.nn.one_hot(jnp.transpose(new_note_ids, (1, 0)).reshape(s * b),
                         n_note, dtype=jnp.float32)
    ohc = jax.nn.one_hot(jnp.transpose(new_chunk_ids, (1, 0)).reshape(s * b),
                         n_chunk, dtype=jnp.float32)
    x_cat = jnp.concatenate([x_tm, ohn, ohc], axis=-1)                 # (S*B, dcat)

    # ---- fold embedding gathers through the combine Linear; pack with bias/LN params.
    w = params["combine_w"]                       # (3h, h): rows [inputs | note | chunk]
    emb_w = jnp.concatenate([w[:h],
                             params["note_emb"] @ w[h:2 * h],
                             params["chunk_emb"] @ w[2 * h:3 * h]], axis=0)   # (dcat, h)
    emb_pack = jnp.concatenate([emb_w, params["combine_b"],
                                params["ln_gamma"], params["ln_beta"]], axis=0)

    l1_pack = _pack_bilstm_layer(params["lstm"][0], hh, rev_input_halves=False)
    l2_pack = _pack_bilstm_layer(params["lstm"][1], hh, rev_input_halves=True)

    # classifier pack: rows 0:h act on h(last step) with the bwd half zeroed,
    # rows h:2h act on h(first step) with the fwd half zeroed, last row = bias.
    zl = jnp.zeros((hh, num_labels), jnp.float32)
    cls_pack = jnp.concatenate([params["cls_w"][0:hh], zl,
                                zl, params["cls_w"][hh:h],
                                params["cls_b"]], axis=0)              # (2h+1, L)

    kernel = functools.partial(_fused_forward_kernel, S=s, B=b, HH=hh,
                               DCAT=dcat, eps=cfg.layer_norm_eps)
    pred2d = pl.pallas_call(
        kernel,
        out_shape=jax.ShapeDtypeStruct((b, num_labels), jnp.float32),
        in_specs=[_VMEM_SPEC] * 5,
        out_specs=_VMEM_SPEC,
        scratch_shapes=[pltpu.VMEM((s * b, h), jnp.float32)],   # loop-order layer-1 output
    )(x_cat, emb_pack, l1_pack, l2_pack, cls_pack)

    # torch: pred = sigmoid(logits).squeeze(1) -> shape (B,) when num_labels == 1.
    pred = pred2d[:, 0] if num_labels == 1 else pred2d
    if labels is not None:
        # TODO(synk): BCELoss path mirrors the reference usage (labels shaped like pred).
        y = labels.astype(jnp.float32).reshape(pred.shape)
        p = jnp.clip(pred, 1e-7, 1.0 - 1e-7)
        loss = jnp.mean(-(y * jnp.log(p) + (1.0 - y) * jnp.log(1.0 - p)))
        return loss, pred
    return pred


# -------------------------------- main --------------------------------------

if __name__ == "__main__":
    cfg = Config(hidden_size=32, lstm_layers=2, hidden_dropout_prob=0.1,
                 embed_mode="all", max_note_position_embedding=16,
                 max_chunk_position_embedding=16, layer_norm_eps=1e-12,
                 initializer_range=0.02)
    num_labels = 1
    B, S = 2, 8

    key = jax.random.PRNGKey(0)
    kp, kx, kn, kc, kl = jax.random.split(key, 5)
    params = init_params(kp, cfg, num_labels)

    inputs = jax.random.normal(kx, (B, S, cfg.hidden_size), jnp.float32)
    new_note_ids = jax.random.randint(
        kn, (B, S), 0, cfg.max_note_position_embedding, dtype=jnp.int32)
    new_chunk_ids = jax.random.randint(
        kc, (B, S), 0, cfg.max_chunk_position_embedding, dtype=jnp.int32)
    labels = jax.random.randint(kl, (B,), 0, 2, dtype=jnp.int32)

    fwd = jax.jit(lstm_layer_forward, static_argnums=(1,))
    pred = fwd(params, cfg, inputs, new_note_ids, new_chunk_ids)
    loss, pred2 = fwd(params, cfg, inputs, new_note_ids, new_chunk_ids, labels)
    jax.block_until_ready((pred, loss, pred2))
    print("KERNEL_OK")
</pallas_src>

<mosaic_0001>
module attributes {stable_mosaic.version = 11 : i64} {
  func.func @_fused_forward_kernel(%arg0: memref<16x64xf32, #tpu.memory_space<vmem>>, %arg1: memref<67x32xf32, #tpu.memory_space<vmem>>, %arg2: memref<65x256xf32, #tpu.memory_space<vmem>>, %arg3: memref<65x256xf32, #tpu.memory_space<vmem>>, %arg4: memref<65x1xf32, #tpu.memory_space<vmem>>, %arg5: memref<2x1xf32, #tpu.memory_space<vmem>>, %arg6: memref<16x32xf32, #tpu.memory_space<vmem>>) attributes {dimension_semantics = [], scalar_prefetch = 0 : i64, scratch_operands = 1 : i64, tpu.core_type = #tpu.core_type<tc>} {
    %c0 = arith.constant 0 : index
    %c0_0 = arith.constant 0 : index
    %0 = vector.load %arg0[%c0, %c0_0] : memref<16x64xf32, #tpu.memory_space<vmem>>, vector<16x64xf32>
    %c0_1 = arith.constant 0 : index
    %c0_2 = arith.constant 0 : index
    %1 = vector.load %arg1[%c0_1, %c0_2] : memref<67x32xf32, #tpu.memory_space<vmem>>, vector<64x32xf32>
    %cst = arith.constant dense<0.000000e+00> : vector<16x32xf32>
    %2 = tpu.matmul %0, %1, %cst {dimension_numbers = #tpu.dot_dimension_numbers<[1], [0], [0], [1], [0, 0, 1, 1], [], []>} : vector<16x64xf32>, vector<64x32xf32>, vector<16x32xf32> -> vector<16x32xf32>
    %c64 = arith.constant 64 : index
    %c0_3 = arith.constant 0 : index
    %3 = vector.load %arg1[%c64, %c0_3] : memref<67x32xf32, #tpu.memory_space<vmem>>, vector<1x32xf32>
    %4 = vector.broadcast %3 : vector<1x32xf32> to vector<16x32xf32>
    %5 = arith.addf %2, %4 : vector<16x32xf32>
    %cst_4 = arith.constant dense<0.000000e+00> : vector<16xf32>
    %6 = vector.multi_reduction <add>, %5, %cst_4 [1] : vector<16x32xf32> to vector<16xf32>
    %7 = vector.shape_cast %6 : vector<16xf32> to vector<16x1xf32>
    %cst_5 = arith.constant 3.200000e+01 : f32
    %8 = vector.broadcast %cst_5 : f32 to vector<16x1xf32>
    %9 = arith.divf %7, %8 : vector<16x1xf32>
    %10 = vector.broadcast %9 : vector<16x1xf32> to vector<16x32xf32>
    %11 = arith.subf %5, %10 : vector<16x32xf32>
    %12 = arith.mulf %11, %11 : vector<16x32xf32>
    %cst_6 = arith.constant dense<0.000000e+00> : vector<16xf32>
    %13 = vector.multi_reduction <add>, %12, %cst_6 [1] : vector<16x32xf32> to vector<16xf32>
    %14 = vector.shape_cast %13 : vector<16xf32> to vector<16x1xf32>
    %cst_7 = arith.constant 3.200000e+01 : f32
    %15 = vector.broadcast %cst_7 : f32 to vector<16x1xf32>
    %16 = arith.divf %14, %15 : vector<16x1xf32>
    %17 = vector.broadcast %9 : vector<16x1xf32> to vector<16x32xf32>
    %18 = arith.subf %5, %17 : vector<16x32xf32>
    %cst_8 = arith.constant 9.99999996E-13 : f32
    %19 = vector.broadcast %cst_8 : f32 to vector<16x1xf32>
    %20 = arith.addf %16, %19 : vector<16x1xf32>
    %21 = math.rsqrt %20 : vector<16x1xf32>
    %22 = vector.broadcast %21 : vector<16x1xf32> to vector<16x32xf32>
    %23 = arith.mulf %18, %22 : vector<16x32xf32>
    %c65 = arith.constant 65 : index
    %c0_9 = arith.constant 0 : index
    %24 = vector.load %arg1[%c65, %c0_9] : memref<67x32xf32, #tpu.memory_space<vmem>>, vector<1x32xf32>
    %25 = vector.broadcast %24 : vector<1x32xf32> to vector<16x32xf32>
    %26 = arith.mulf %23, %25 : vector<16x32xf32>
    %c66 = arith.constant 66 : index
    %c0_10 = arith.constant 0 : index
    %27 = vector.load %arg1[%c66, %c0_10] : memref<67x32xf32, #tpu.memory_space<vmem>>, vector<1x32xf32>
    %28 = vector.broadcast %27 : vector<1x32xf32> to vector<16x32xf32>
    %29 = arith.addf %26, %28 : vector<16x32xf32>
    %c0_11 = arith.constant 0 : index
    %c0_12 = arith.constant 0 : index
    %30 = vector.load %arg2[%c0_11, %c0_12] : memref<65x256xf32, #tpu.memory_space<vmem>>, vector<32x256xf32>
    %cst_13 = arith.constant dense<0.000000e+00> : vector<16x256xf32>
    %31 = tpu.matmul %29, %30, %cst_13 {dimension_numbers = #tpu.dot_dimension_numbers<[1], [0], [0], [1], [0, 0, 1, 1], [], []>} : vector<16x32xf32>, vector<32x256xf32>, vector<16x256xf32> -> vector<16x256xf32>
    %c32 = arith.constant 32 : index
    %c0_14 = arith.constant 0 : index
    %32 = vector.load %arg2[%c32, %c0_14] : memref<65x256xf32, #tpu.memory_space<vmem>>, vector<32x128xf32>
    %c64_15 = arith.constant 64 : index
    %c0_16 = arith.constant 0 : index
    %33 = vector.load %arg2[%c64_15, %c0_16] : memref<65x256xf32, #tpu.memory_space<vmem>>, vector<1x128xf32>
    %34 = vector.extract_strided_slice %31 {offsets = [0, 0], sizes = [16, 128], strides = [1, 1]} : vector<16x256xf32> to vector<16x128xf32>
    %35 = vector.broadcast %33 : vector<1x128xf32> to vector<16x128xf32>
    %36 = arith.addf %34, %35 : vector<16x128xf32>
    %37 = vector.extract_strided_slice %31 {offsets = [0, 128], sizes = [16, 128], strides = [1, 1]} : vector<16x256xf32> to vector<16x128xf32>
    %cst_17 = arith.constant 0.000000e+00 : f32
    %38 = vector.broadcast %cst_17 : f32 to vector<2x32xf32>
    %cst_18 = arith.constant 0.000000e+00 : f32
    %39 = vector.broadcast %cst_18 : f32 to vector<2x32xf32>
    %40 = vector.extract_strided_slice %36 {offsets = [0, 0], sizes = [2, 128], strides = [1, 1]} : vector<16x128xf32> to vector<2x128xf32>
    %41 = vector.extract_strided_slice %37 {offsets = [14, 0], sizes = [2, 128], strides = [1, 1]} : vector<16x128xf32> to vector<2x128xf32>
    %42 = arith.addf %40, %41 : vector<2x128xf32>
    %cst_19 = arith.constant dense<0.000000e+00> : vector<2x128xf32>
    %43 = tpu.matmul %38, %32, %cst_19 {dimension_numbers = #tpu.dot_dimension_numbers<[1], [0], [0], [1], [0, 0, 1, 1], [], []>} : vector<2x32xf32>, vector<32x128xf32>, vector<2x128xf32> -> vector<2x128xf32>
    %44 = arith.addf %42, %43 : vector<2x128xf32>
    %45 = vector.extract_strided_slice %44 {offsets = [0, 0], sizes = [2, 96], strides = [1, 1]} : vector<2x128xf32> to vector<2x96xf32>
    %46 = arith.negf %45 : vector<2x96xf32>
    %47 = math.exp %46 : vector<2x96xf32>
    %cst_20 = arith.constant 1.000000e+00 : f32
    %48 = vector.broadcast %cst_20 : f32 to vector<2x96xf32>
    %49 = arith.addf %48, %47 : vector<2x96xf32>
    %50 = arith.divf %48, %49 : vector<2x96xf32>
    %51 = vector.extract_strided_slice %44 {offsets = [0, 96], sizes = [2, 32], strides = [1, 1]} : vector<2x128xf32> to vector<2x32xf32>
    %52 = math.tanh %51 : vector<2x32xf32>
    %53 = vector.extract_strided_slice %50 {offsets = [0, 0], sizes = [2, 32], strides = [1, 1]} : vector<2x96xf32> to vector<2x32xf32>
    %54 = vector.extract_strided_slice %50 {offsets = [0, 32], sizes = [2, 32], strides = [1, 1]} : vector<2x96xf32> to vector<2x32xf32>
    %55 = vector.extract_strided_slice %50 {offsets = [0, 64], sizes = [2, 32], strides = [1, 1]} : vector<2x96xf32> to vector<2x32xf32>
    %56 = arith.mulf %54, %39 : vector<2x32xf32>
    %57 = arith.mulf %53, %52 : vector<2x32xf32>
    %58 = arith.addf %56, %57 : vector<2x32xf32>
    %59 = math.tanh %58 : vector<2x32xf32>
    %60 = arith.mulf %55, %59 : vector<2x32xf32>
    %c0_21 = arith.constant 0 : index
    %c0_22 = arith.constant 0 : index
    %61 = vector.load %arg6[%c0_21, %c0_22] : memref<16x32xf32, #tpu.memory_space<vmem>>, vector<2x32xf32>
    tpu.vector_store %arg6[%c0_21, %c0_22], %60 {strides = array<i32>} : memref<16x32xf32, #tpu.memory_space<vmem>>, vector<2x32xf32>,
    %62 = vector.extract_strided_slice %36 {offsets = [2, 0], sizes = [2, 128], strides = [1, 1]} : vector<16x128xf32> to vector<2x128xf32>
    %63 = vector.extract_strided_slice %37 {offsets = [12, 0], sizes = [2, 128], strides = [1, 1]} : vector<16x128xf32> to vector<2x128xf32>
    %64 = arith.addf %62, %63 : vector<2x128xf32>
    %cst_23 = arith.constant dense<0.000000e+00> : vector<2x128xf32>
    %65 = tpu.matmul %60, %32, %cst_23 {dimension_numbers = #tpu.dot_dimension_numbers<[1], [0], [0], [1], [0, 0, 1, 1], [], []>} : vector<2x32xf32>, vector<32x128xf32>, vector<2x128xf32> -> vector<2x128xf32>
    %66 = arith.addf %64, %65 : vector<2x128xf32>
    %67 = vector.extract_strided_slice %66 {offsets = [0, 0], sizes = [2, 96], strides = [1, 1]} : vector<2x128xf32> to vector<2x96xf32>
    %68 = arith.negf %67 : vector<2x96xf32>
    %69 = math.exp %68 : vector<2x96xf32>
    %cst_24 = arith.constant 1.000000e+00 : f32
    %70 = vector.broadcast %cst_24 : f32 to vector<2x96xf32>
    %71 = arith.addf %70, %69 : vector<2x96xf32>
    %72 = arith.divf %70, %71 : vector<2x96xf32>
    %73 = vector.extract_strided_slice %66 {offsets = [0, 96], sizes = [2, 32], strides = [1, 1]} : vector<2x128xf32> to vector<2x32xf32>
    %74 = math.tanh %73 : vector<2x32xf32>
    %75 = vector.extract_strided_slice %72 {offsets = [0, 0], sizes = [2, 32], strides = [1, 1]} : vector<2x96xf32> to vector<2x32xf32>
    %76 = vector.extract_strided_slice %72 {offsets = [0, 32], sizes = [2, 32], strides = [1, 1]} : vector<2x96xf32> to vector<2x32xf32>
    %77 = vector.extract_strided_slice %72 {offsets = [0, 64], sizes = [2, 32], strides = [1, 1]} : vector<2x96xf32> to vector<2x32xf32>
    %78 = arith.mulf %76, %58 : vector<2x32xf32>
    %79 = arith.mulf %75, %74 : vector<2x32xf32>
    %80 = arith.addf %78, %79 : vector<2x32xf32>
    %81 = math.tanh %80 : vector<2x32xf32>
    %82 = arith.mulf %77, %81 : vector<2x32xf32>
    %c2 = arith.constant 2 : index
    %c0_25 = arith.constant 0 : index
    %83 = vector.load %arg6[%c2, %c0_25] : memref<16x32xf32, #tpu.memory_space<vmem>>, vector<2x32xf32>
    tpu.vector_store %arg6[%c2, %c0_25], %82 {strides = array<i32>} : memref<16x32xf32, #tpu.memory_space<vmem>>, vector<2x32xf32>,
    %84 = vector.extract_strided_slice %36 {offsets = [4, 0], sizes = [2, 128], strides = [1, 1]} : vector<16x128xf32> to vector<2x128xf32>
    %85 = vector.extract_strided_slice %37 {offsets = [10, 0], sizes = [2, 128], strides = [1, 1]} : vector<16x128xf32> to vector<2x128xf32>
    %86 = arith.addf %84, %85 : vector<2x128xf32>
    %cst_26 = arith.constant dense<0.000000e+00> : vector<2x128xf32>
    %87 = tpu.matmul %82, %32, %cst_26 {dimension_numbers = #tpu.dot_dimension_numbers<[1], [0], [0], [1], [0, 0, 1, 1], [], []>} : vector<2x32xf32>, vector<32x128xf32>, vector<2x128xf32> -> vector<2x128xf32>
    %88 = arith.addf %86, %87 : vector<2x128xf32>
    %89 = vector.extract_strided_slice %88 {offsets = [0, 0], sizes = [2, 96], strides = [1, 1]} : vector<2x128xf32> to vector<2x96xf32>
    %90 = arith.negf %89 : vector<2x96xf32>
    %91 = math.exp %90 : vector<2x96xf32>
    %cst_27 = arith.constant 1.000000e+00 : f32
    %92 = vector.broadcast %cst_27 : f32 to vector<2x96xf32>
    %93 = arith.addf %92, %91 : vector<2x96xf32>
    %94 = arith.divf %92, %93 : vector<2x96xf32>
    %95 = vector.extract_strided_slice %88 {offsets = [0, 96], sizes = [2, 32], strides = [1, 1]} : vector<2x128xf32> to vector<2x32xf32>
    %96 = math.tanh %95 : vector<2x32xf32>
    %97 = vector.extract_strided_slice %94 {offsets = [0, 0], sizes = [2, 32], strides = [1, 1]} : vector<2x96xf32> to vector<2x32xf32>
    %98 = vector.extract_strided_slice %94 {offsets = [0, 32], sizes = [2, 32], strides = [1, 1]} : vector<2x96xf32> to vector<2x32xf32>
    %99 = vector.extract_strided_slice %94 {offsets = [0, 64], sizes = [2, 32], strides = [1, 1]} : vector<2x96xf32> to vector<2x32xf32>
    %100 = arith.mulf %98, %80 : vector<2x32xf32>
    %101 = arith.mulf %97, %96 : vector<2x32xf32>
    %102 = arith.addf %100, %101 : vector<2x32xf32>
    %103 = math.tanh %102 : vector<2x32xf32>
    %104 = arith.mulf %99, %103 : vector<2x32xf32>
    %c4 = arith.constant 4 : index
    %c0_28 = arith.constant 0 : index
    %105 = vector.load %arg6[%c4, %c0_28] : memref<16x32xf32, #tpu.memory_space<vmem>>, vector<2x32xf32>
    tpu.vector_store %arg6[%c4, %c0_28], %104 {strides = array<i32>} : memref<16x32xf32, #tpu.memory_space<vmem>>, vector<2x32xf32>,
    %106 = vector.extract_strided_slice %36 {offsets = [6, 0], sizes = [2, 128], strides = [1, 1]} : vector<16x128xf32> to vector<2x128xf32>
    %107 = vector.extract_strided_slice %37 {offsets = [8, 0], sizes = [2, 128], strides = [1, 1]} : vector<16x128xf32> to vector<2x128xf32>
    %108 = arith.addf %106, %107 : vector<2x128xf32>
    %cst_29 = arith.constant dense<0.000000e+00> : vector<2x128xf32>
    %109 = tpu.matmul %104, %32, %cst_29 {dimension_numbers = #tpu.dot_dimension_numbers<[1], [0], [0], [1], [0, 0, 1, 1], [], []>} : vector<2x32xf32>, vector<32x128xf32>, vector<2x128xf32> -> vector<2x128xf32>
    %110 = arith.addf %108, %109 : vector<2x128xf32>
    %111 = vector.extract_strided_slice %110 {offsets = [0, 0], sizes = [2, 96], strides = [1, 1]} : vector<2x128xf32> to vector<2x96xf32>
    %112 = arith.negf %111 : vector<2x96xf32>
    %113 = math.exp %112 : vector<2x96xf32>
    %cst_30 = arith.constant 1.000000e+00 : f32
    %114 = vector.broadcast %cst_30 : f32 to vector<2x96xf32>
    %115 = arith.addf %114, %113 : vector<2x96xf32>
    %116 = arith.divf %114, %115 : vector<2x96xf32>
    %117 = vector.extract_strided_slice %110 {offsets = [0, 96], sizes = [2, 32], strides = [1, 1]} : vector<2x128xf32> to vector<2x32xf32>
    %118 = math.tanh %117 : vector<2x32xf32>
    %119 = vector.extract_strided_slice %116 {offsets = [0, 0], sizes = [2, 32], strides = [1, 1]} : vector<2x96xf32> to vector<2x32xf32>
    %120 = vector.extract_strided_slice %116 {offsets = [0, 32], sizes = [2, 32], strides = [1, 1]} : vector<2x96xf32> to vector<2x32xf32>
    %121 = vector.extract_strided_slice %116 {offsets = [0, 64], sizes = [2, 32], strides = [1, 1]} : vector<2x96xf32> to vector<2x32xf32>
    %122 = arith.mulf %120, %102 : vector<2x32xf32>
    %123 = arith.mulf %119, %118 : vector<2x32xf32>
    %124 = arith.addf %122, %123 : vector<2x32xf32>
    %125 = math.tanh %124 : vector<2x32xf32>
    %126 = arith.mulf %121, %125 : vector<2x32xf32>
    %c6 = arith.constant 6 : index
    %c0_31 = arith.constant 0 : index
    %127 = vector.load %arg6[%c6, %c0_31] : memref<16x32xf32, #tpu.memory_space<vmem>>, vector<2x32xf32>
    tpu.vector_store %arg6[%c6, %c0_31], %126 {strides = array<i32>} : memref<16x32xf32, #tpu.memory_space<vmem>>, vector<2x32xf32>,
    %128 = vector.extract_strided_slice %36 {offsets = [8, 0], sizes = [2, 128], strides = [1, 1]} : vector<16x128xf32> to vector<2x128xf32>
    %129 = vector.extract_strided_slice %37 {offsets = [6, 0], sizes = [2, 128], strides = [1, 1]} : vector<16x128xf32> to vector<2x128xf32>
    %130 = arith.addf %128, %129 : vector<2x128xf32>
    %cst_32 = arith.constant dense<0.000000e+00> : vector<2x128xf32>
    %131 = tpu.matmul %126, %32, %cst_32 {dimension_numbers = #tpu.dot_dimension_numbers<[1], [0], [0], [1], [0, 0, 1, 1], [], []>} : vector<2x32xf32>, vector<32x128xf32>, vector<2x128xf32> -> vector<2x128xf32>
    %132 = arith.addf %130, %131 : vector<2x128xf32>
    %133 = vector.extract_strided_slice %132 {offsets = [0, 0], sizes = [2, 96], strides = [1, 1]} : vector<2x128xf32> to vector<2x96xf32>
    %134 = arith.negf %133 : vector<2x96xf32>
    %135 = math.exp %134 : vector<2x96xf32>
    %cst_33 = arith.constant 1.000000e+00 : f32
    %136 = vector.broadcast %cst_33 : f32 to vector<2x96xf32>
    %137 = arith.addf %136, %135 : vector<2x96xf32>
    %138 = arith.divf %136, %137 : vector<2x96xf32>
    %139 = vector.extract_strided_slice %132 {offsets = [0, 96], sizes = [2, 32], strides = [1, 1]} : vector<2x128xf32> to vector<2x32xf32>
    %140 = math.tanh %139 : vector<2x32xf32>
    %141 = vector.extract_strided_slice %138 {offsets = [0, 0], sizes = [2, 32], strides = [1, 1]} : vector<2x96xf32> to vector<2x32xf32>
    %142 = vector.extract_strided_slice %138 {offsets = [0, 32], sizes = [2, 32], strides = [1, 1]} : vector<2x96xf32> to vector<2x32xf32>
    %143 = vector.extract_strided_slice %138 {offsets = [0, 64], sizes = [2, 32], strides = [1, 1]} : vector<2x96xf32> to vector<2x32xf32>
    %144 = arith.mulf %142, %124 : vector<2x32xf32>
    %145 = arith.mulf %141, %140 : vector<2x32xf32>
    %146 = arith.addf %144, %145 : vector<2x32xf32>
    %147 = math.tanh %146 : vector<2x32xf32>
    %148 = arith.mulf %143, %147 : vector<2x32xf32>
    %c8 = arith.constant 8 : index
    %c0_34 = arith.constant 0 : index
    %149 = vector.load %arg6[%c8, %c0_34] : memref<16x32xf32, #tpu.memory_space<vmem>>, vector<2x32xf32>
    tpu.vector_store %arg6[%c8, %c0_34], %148 {strides = array<i32>} : memref<16x32xf32, #tpu.memory_space<vmem>>, vector<2x32xf32>,
    %150 = vector.extract_strided_slice %36 {offsets = [10, 0], sizes = [2, 128], strides = [1, 1]} : vector<16x128xf32> to vector<2x128xf32>
    %151 = vector.extract_strided_slice %37 {offsets = [4, 0], sizes = [2, 128], strides = [1, 1]} : vector<16x128xf32> to vector<2x128xf32>
    %152 = arith.addf %150, %151 : vector<2x128xf32>
    %cst_35 = arith.constant dense<0.000000e+00> : vector<2x128xf32>
    %153 = tpu.matmul %148, %32, %cst_35 {dimension_numbers = #tpu.dot_dimension_numbers<[1], [0], [0], [1], [0, 0, 1, 1], [], []>} : vector<2x32xf32>, vector<32x128xf32>, vector<2x128xf32> -> vector<2x128xf32>
    %154 = arith.addf %152, %153 : vector<2x128xf32>
    %155 = vector.extract_strided_slice %154 {offsets = [0, 0], sizes = [2, 96], strides = [1, 1]} : vector<2x128xf32> to vector<2x96xf32>
    %156 = arith.negf %155 : vector<2x96xf32>
    %157 = math.exp %156 : vector<2x96xf32>
    %cst_36 = arith.constant 1.000000e+00 : f32
    %158 = vector.broadcast %cst_36 : f32 to vector<2x96xf32>
    %159 = arith.addf %158, %157 : vector<2x96xf32>
    %160 = arith.divf %158, %159 : vector<2x96xf32>
    %161 = vector.extract_strided_slice %154 {offsets = [0, 96], sizes = [2, 32], strides = [1, 1]} : vector<2x128xf32> to vector<2x32xf32>
    %162 = math.tanh %161 : vector<2x32xf32>
    %163 = vector.extract_strided_slice %160 {offsets = [0, 0], sizes = [2, 32], strides = [1, 1]} : vector<2x96xf32> to vector<2x32xf32>
    %164 = vector.extract_strided_slice %160 {offsets = [0, 32], sizes = [2, 32], strides = [1, 1]} : vector<2x96xf32> to vector<2x32xf32>
    %165 = vector.extract_strided_slice %160 {offsets = [0, 64], sizes = [2, 32], strides = [1, 1]} : vector<2x96xf32> to vector<2x32xf32>
    %166 = arith.mulf %164, %146 : vector<2x32xf32>
    %167 = arith.mulf %163, %162 : vector<2x32xf32>
    %168 = arith.addf %166, %167 : vector<2x32xf32>
    %169 = math.tanh %168 : vector<2x32xf32>
    %170 = arith.mulf %165, %169 : vector<2x32xf32>
    %c10 = arith.constant 10 : index
    %c0_37 = arith.constant 0 : index
    %171 = vector.load %arg6[%c10, %c0_37] : memref<16x32xf32, #tpu.memory_space<vmem>>, vector<2x32xf32>
    tpu.vector_store %arg6[%c10, %c0_37], %170 {strides = array<i32>} : memref<16x32xf32, #tpu.memory_space<vmem>>, vector<2x32xf32>,
    %172 = vector.extract_strided_slice %36 {offsets = [12, 0], sizes = [2, 128], strides = [1, 1]} : vector<16x128xf32> to vector<2x128xf32>
    %173 = vector.extract_strided_slice %37 {offsets = [2, 0], sizes = [2, 128], strides = [1, 1]} : vector<16x128xf32> to vector<2x128xf32>
    %174 = arith.addf %172, %173 : vector<2x128xf32>
    %cst_38 = arith.constant dense<0.000000e+00> : vector<2x128xf32>
    %175 = tpu.matmul %170, %32, %cst_38 {dimension_numbers = #tpu.dot_dimension_numbers<[1], [0], [0], [1], [0, 0, 1, 1], [], []>} : vector<2x32xf32>, vector<32x128xf32>, vector<2x128xf32> -> vector<2x128xf32>
    %176 = arith.addf %174, %175 : vector<2x128xf32>
    %177 = vector.extract_strided_slice %176 {offsets = [0, 0], sizes = [2, 96], strides = [1, 1]} : vector<2x128xf32> to vector<2x96xf32>
    %178 = arith.negf %177 : vector<2x96xf32>
    %179 = math.exp %178 : vector<2x96xf32>
    %cst_39 = arith.constant 1.000000e+00 : f32
    %180 = vector.broadcast %cst_39 : f32 to vector<2x96xf32>
    %181 = arith.addf %180, %179 : vector<2x96xf32>
    %182 = arith.divf %180, %181 : vector<2x96xf32>
    %183 = vector.extract_strided_slice %176 {offsets = [0, 96], sizes = [2, 32], strides = [1, 1]} : vector<2x128xf32> to vector<2x32xf32>
    %184 = math.tanh %183 : vector<2x32xf32>
    %185 = vector.extract_strided_slice %182 {offsets = [0, 0], sizes = [2, 32], strides = [1, 1]} : vector<2x96xf32> to vector<2x32xf32>
    %186 = vector.extract_strided_slice %182 {offsets = [0, 32], sizes = [2, 32], strides = [1, 1]} : vector<2x96xf32> to vector<2x32xf32>
    %187 = vector.extract_strided_slice %182 {offsets = [0, 64], sizes = [2, 32], strides = [1, 1]} : vector<2x96xf32> to vector<2x32xf32>
    %188 = arith.mulf %186, %168 : vector<2x32xf32>
    %189 = arith.mulf %185, %184 : vector<2x32xf32>
    %190 = arith.addf %188, %189 : vector<2x32xf32>
    %191 = math.tanh %190 : vector<2x32xf32>
    %192 = arith.mulf %187, %191 : vector<2x32xf32>
    %c12 = arith.constant 12 : index
    %c0_40 = arith.constant 0 : index
    %193 = vector.load %arg6[%c12, %c0_40] : memref<16x32xf32, #tpu.memory_space<vmem>>, vector<2x32xf32>
    tpu.vector_store %arg6[%c12, %c0_40], %192 {strides = array<i32>} : memref<16x32xf32, #tpu.memory_space<vmem>>, vector<2x32xf32>,
    %194 = vector.extract_strided_slice %36 {offsets = [14, 0], sizes = [2, 128], strides = [1, 1]} : vector<16x128xf32> to vector<2x128xf32>
    %195 = vector.extract_strided_slice %37 {offsets = [0, 0], sizes = [2, 128], strides = [1, 1]} : vector<16x128xf32> to vector<2x128xf32>
    %196 = arith.addf %194, %195 : vector<2x128xf32>
    %cst_41 = arith.constant dense<0.000000e+00> : vector<2x128xf32>
    %197 = tpu.matmul %192, %32, %cst_41 {dimension_numbers = #tpu.dot_dimension_numbers<[1], [0], [0], [1], [0, 0, 1, 1], [], []>} : vector<2x32xf32>, vector<32x128xf32>, vector<2x128xf32> -> vector<2x128xf32>
    %198 = arith.addf %196, %197 : vector<2x128xf32>
    %199 = vector.extract_strided_slice %198 {offsets = [0, 0], sizes = [2, 96], strides = [1, 1]} : vector<2x128xf32> to vector<2x96xf32>
    %200 = arith.negf %199 : vector<2x96xf32>
    %201 = math.exp %200 : vector<2x96xf32>
    %cst_42 = arith.constant 1.000000e+00 : f32
    %202 = vector.broadcast %cst_42 : f32 to vector<2x96xf32>
    %203 = arith.addf %202, %201 : vector<2x96xf32>
    %204 = arith.divf %202, %203 : vector<2x96xf32>
    %205 = vector.extract_strided_slice %198 {offsets = [0, 96], sizes = [2, 32], strides = [1, 1]} : vector<2x128xf32> to vector<2x32xf32>
    %206 = math.tanh %205 : vector<2x32xf32>
    %207 = vector.extract_strided_slice %204 {offsets = [0, 0], sizes = [2, 32], strides = [1, 1]} : vector<2x96xf32> to vector<2x32xf32>
    %208 = vector.extract_strided_slice %204 {offsets = [0, 32], sizes = [2, 32], strides = [1, 1]} : vector<2x96xf32> to vector<2x32xf32>
    %209 = vector.extract_strided_slice %204 {offsets = [0, 64], sizes = [2, 32], strides = [1, 1]} : vector<2x96xf32> to vector<2x32xf32>
    %210 = arith.mulf %208, %190 : vector<2x32xf32>
    %211 = arith.mulf %207, %206 : vector<2x32xf32>
    %212 = arith.addf %210, %211 : vector<2x32xf32>
    %213 = math.tanh %212 : vector<2x32xf32>
    %214 = arith.mulf %209, %213 : vector<2x32xf32>
    %c14 = arith.constant 14 : index
    %c0_43 = arith.constant 0 : index
    %215 = vector.load %arg6[%c14, %c0_43] : memref<16x32xf32, #tpu.memory_space<vmem>>, vector<2x32xf32>
    tpu.vector_store %arg6[%c14, %c0_43], %214 {strides = array<i32>} : memref<16x32xf32, #tpu.memory_space<vmem>>, vector<2x32xf32>,
    %c0_44 = arith.constant 0 : index
    %c0_45 = arith.constant 0 : index
    %216 = vector.load %arg6[%c0_44, %c0_45] : memref<16x32xf32, #tpu.memory_space<vmem>>, vector<16x32xf32>
    %c0_46 = arith.constant 0 : index
    %c0_47 = arith.constant 0 : index
    %217 = vector.load %arg3[%c0_46, %c0_47] : memref<65x256xf32, #tpu.memory_space<vmem>>, vector<32x256xf32>
    %cst_48 = arith.constant dense<0.000000e+00> : vector<16x256xf32>
    %218 = tpu.matmul %216, %217, %cst_48 {dimension_numbers = #tpu.dot_dimension_numbers<[1], [0], [0], [1], [0, 0, 1, 1], [], []>} : vector<16x32xf32>, vector<32x256xf32>, vector<16x256xf32> -> vector<16x256xf32>
    %c32_49 = arith.constant 32 : index
    %c0_50 = arith.constant 0 : index
    %219 = vector.load %arg3[%c32_49, %c0_50] : memref<65x256xf32, #tpu.memory_space<vmem>>, vector<32x128xf32>
    %c64_51 = arith.constant 64 : index
    %c0_52 = arith.constant 0 : index
    %220 = vector.load %arg3[%c64_51, %c0_52] : memref<65x256xf32, #tpu.memory_space<vmem>>, vector<1x128xf32>
    %221 = vector.extract_strided_slice %218 {offsets = [0, 0], sizes = [16, 128], strides = [1, 1]} : vector<16x256xf32> to vector<16x128xf32>
    %222 = vector.broadcast %220 : vector<1x128xf32> to vector<16x128xf32>
    %223 = arith.addf %221, %222 : vector<16x128xf32>
    %224 = vector.extract_strided_slice %218 {offsets = [0, 128], sizes = [16, 128], strides = [1, 1]} : vector<16x256xf32> to vector<16x128xf32>
    %cst_53 = arith.constant 0.000000e+00 : f32
    %225 = vector.broadcast %cst_53 : f32 to vector<2x32xf32>
    %cst_54 = arith.constant 0.000000e+00 : f32
    %226 = vector.broadcast %cst_54 : f32 to vector<2x32xf32>
    %227 = vector.extract_strided_slice %223 {offsets = [0, 0], sizes = [2, 128], strides = [1, 1]} : vector<16x128xf32> to vector<2x128xf32>
    %228 = vector.extract_strided_slice %224 {offsets = [14, 0], sizes = [2, 128], strides = [1, 1]} : vector<16x128xf32> to vector<2x128xf32>
    %229 = arith.addf %227, %228 : vector<2x128xf32>
    %cst_55 = arith.constant dense<0.000000e+00> : vector<2x128xf32>
    %230 = tpu.matmul %225, %219, %cst_55 {dimension_numbers = #tpu.dot_dimension_numbers<[1], [0], [0], [1], [0, 0, 1, 1], [], []>} : vector<2x32xf32>, vector<32x128xf32>, vector<2x128xf32> -> vector<2x128xf32>
    %231 = arith.addf %229, %230 : vector<2x128xf32>
    %232 = vector.extract_strided_slice %231 {offsets = [0, 0], sizes = [2, 96], strides = [1, 1]} : vector<2x128xf32> to vector<2x96xf32>
    %233 = arith.negf %232 : vector<2x96xf32>
    %234 = math.exp %233 : vector<2x96xf32>
    %cst_56 = arith.constant 1.000000e+00 : f32
    %235 = vector.broadcast %cst_56 : f32 to vector<2x96xf32>
    %236 = arith.addf %235, %234 : vector<2x96xf32>
    %237 = arith.divf %235, %236 : vector<2x96xf32>
    %238 = vector.extract_strided_slice %231 {offsets = [0, 96], sizes = [2, 32], strides = [1, 1]} : vector<2x128xf32> to vector<2x32xf32>
    %239 = math.tanh %238 : vector<2x32xf32>
    %240 = vector.extract_strided_slice %237 {offsets = [0, 0], sizes = [2, 32], strides = [1, 1]} : vector<2x96xf32> to vector<2x32xf32>
    %241 = vector.extract_strided_slice %237 {offsets = [0, 32], sizes = [2, 32], strides = [1, 1]} : vector<2x96xf32> to vector<2x32xf32>
    %242 = vector.extract_strided_slice %237 {offsets = [0, 64], sizes = [2, 32], strides = [1, 1]} : vector<2x96xf32> to vector<2x32xf32>
    %243 = arith.mulf %241, %226 : vector<2x32xf32>
    %244 = arith.mulf %240, %239 : vector<2x32xf32>
    %245 = arith.addf %243, %244 : vector<2x32xf32>
    %246 = math.tanh %245 : vector<2x32xf32>
    %247 = arith.mulf %242, %246 : vector<2x32xf32>
    %248 = vector.extract_strided_slice %223 {offsets = [2, 0], sizes = [2, 128], strides = [1, 1]} : vector<16x128xf32> to vector<2x128xf32>
    %249 = vector.extract_strided_slice %224 {offsets = [12, 0], sizes = [2, 128], strides = [1, 1]} : vector<16x128xf32> to vector<2x128xf32>
    %250 = arith.addf %248, %249 : vector<2x128xf32>
    %cst_57 = arith.constant dense<0.000000e+00> : vector<2x128xf32>
    %251 = tpu.matmul %247, %219, %cst_57 {dimension_numbers = #tpu.dot_dimension_numbers<[1], [0], [0], [1], [0, 0, 1, 1], [], []>} : vector<2x32xf32>, vector<32x128xf32>, vector<2x128xf32> -> vector<2x128xf32>
    %252 = arith.addf %250, %251 : vector<2x128xf32>
    %253 = vector.extract_strided_slice %252 {offsets = [0, 0], sizes = [2, 96], strides = [1, 1]} : vector<2x128xf32> to vector<2x96xf32>
    %254 = arith.negf %253 : vector<2x96xf32>
    %255 = math.exp %254 : vector<2x96xf32>
    %cst_58 = arith.constant 1.000000e+00 : f32
    %256 = vector.broadcast %cst_58 : f32 to vector<2x96xf32>
    %257 = arith.addf %256, %255 : vector<2x96xf32>
    %258 = arith.divf %256, %257 : vector<2x96xf32>
    %259 = vector.extract_strided_slice %252 {offsets = [0, 96], sizes = [2, 32], strides = [1, 1]} : vector<2x128xf32> to vector<2x32xf32>
    %260 = math.tanh %259 : vector<2x32xf32>
    %261 = vector.extract_strided_slice %258 {offsets = [0, 0], sizes = [2, 32], strides = [1, 1]} : vector<2x96xf32> to vector<2x32xf32>
    %262 = vector.extract_strided_slice %258 {offsets = [0, 32], sizes = [2, 32], strides = [1, 1]} : vector<2x96xf32> to vector<2x32xf32>
    %263 = vector.extract_strided_slice %258 {offsets = [0, 64], sizes = [2, 32], strides = [1, 1]} : vector<2x96xf32> to vector<2x32xf32>
    %264 = arith.mulf %262, %245 : vector<2x32xf32>
    %265 = arith.mulf %261, %260 : vector<2x32xf32>
    %266 = arith.addf %264, %265 : vector<2x32xf32>
    %267 = math.tanh %266 : vector<2x32xf32>
    %268 = arith.mulf %263, %267 : vector<2x32xf32>
    %269 = vector.extract_strided_slice %223 {offsets = [4, 0], sizes = [2, 128], strides = [1, 1]} : vector<16x128xf32> to vector<2x128xf32>
    %270 = vector.extract_strided_slice %224 {offsets = [10, 0], sizes = [2, 128], strides = [1, 1]} : vector<16x128xf32> to vector<2x128xf32>
    %271 = arith.addf %269, %270 : vector<2x128xf32>
    %cst_59 = arith.constant dense<0.000000e+00> : vector<2x128xf32>
    %272 = tpu.matmul %268, %219, %cst_59 {dimension_numbers = #tpu.dot_dimension_numbers<[1], [0], [0], [1], [0, 0, 1, 1], [], []>} : vector<2x32xf32>, vector<32x128xf32>, vector<2x128xf32> -> vector<2x128xf32>
    %273 = arith.addf %271, %272 : vector<2x128xf32>
    %274 = vector.extract_strided_slice %273 {offsets = [0, 0], sizes = [2, 96], strides = [1, 1]} : vector<2x128xf32> to vector<2x96xf32>
    %275 = arith.negf %274 : vector<2x96xf32>
    %276 = math.exp %275 : vector<2x96xf32>
    %cst_60 = arith.constant 1.000000e+00 : f32
    %277 = vector.broadcast %cst_60 : f32 to vector<2x96xf32>
    %278 = arith.addf %277, %276 : vector<2x96xf32>
    %279 = arith.divf %277, %278 : vector<2x96xf32>
    %280 = vector.extract_strided_slice %273 {offsets = [0, 96], sizes = [2, 32], strides = [1, 1]} : vector<2x128xf32> to vector<2x32xf32>
    %281 = math.tanh %280 : vector<2x32xf32>
    %282 = vector.extract_strided_slice %279 {offsets = [0, 0], sizes = [2, 32], strides = [1, 1]} : vector<2x96xf32> to vector<2x32xf32>
    %283 = vector.extract_strided_slice %279 {offsets = [0, 32], sizes = [2, 32], strides = [1, 1]} : vector<2x96xf32> to vector<2x32xf32>
    %284 = vector.extract_strided_slice %279 {offsets = [0, 64], sizes = [2, 32], strides = [1, 1]} : vector<2x96xf32> to vector<2x32xf32>
    %285 = arith.mulf %283, %266 : vector<2x32xf32>
    %286 = arith.mulf %282, %281 : vector<2x32xf32>
    %287 = arith.addf %285, %286 : vector<2x32xf32>
    %288 = math.tanh %287 : vector<2x32xf32>
    %289 = arith.mulf %284, %288 : vector<2x32xf32>
    %290 = vector.extract_strided_slice %223 {offsets = [6, 0], sizes = [2, 128], strides = [1, 1]} : vector<16x128xf32> to vector<2x128xf32>
    %291 = vector.extract_strided_slice %224 {offsets = [8, 0], sizes = [2, 128], strides = [1, 1]} : vector<16x128xf32> to vector<2x128xf32>
    %292 = arith.addf %290, %291 : vector<2x128xf32>
    %cst_61 = arith.constant dense<0.000000e+00> : vector<2x128xf32>
    %293 = tpu.matmul %289, %219, %cst_61 {dimension_numbers = #tpu.dot_dimension_numbers<[1], [0], [0], [1], [0, 0, 1, 1], [], []>} : vector<2x32xf32>, vector<32x128xf32>, vector<2x128xf32> -> vector<2x128xf32>
    %294 = arith.addf %292, %293 : vector<2x128xf32>
    %295 = vector.extract_strided_slice %294 {offsets = [0, 0], sizes = [2, 96], strides = [1, 1]} : vector<2x128xf32> to vector<2x96xf32>
    %296 = arith.negf %295 : vector<2x96xf32>
    %297 = math.exp %296 : vector<2x96xf32>
    %cst_62 = arith.constant 1.000000e+00 : f32
    %298 = vector.broadcast %cst_62 : f32 to vector<2x96xf32>
    %299 = arith.addf %298, %297 : vector<2x96xf32>
    %300 = arith.divf %298, %299 : vector<2x96xf32>
    %301 = vector.extract_strided_slice %294 {offsets = [0, 96], sizes = [2, 32], strides = [1, 1]} : vector<2x128xf32> to vector<2x32xf32>
    %302 = math.tanh %301 : vector<2x32xf32>
    %303 = vector.extract_strided_slice %300 {offsets = [0, 0], sizes = [2, 32], strides = [1, 1]} : vector<2x96xf32> to vector<2x32xf32>
    %304 = vector.extract_strided_slice %300 {offsets = [0, 32], sizes = [2, 32], strides = [1, 1]} : vector<2x96xf32> to vector<2x32xf32>
    %305 = vector.extract_strided_slice %300 {offsets = [0, 64], sizes = [2, 32], strides = [1, 1]} : vector<2x96xf32> to vector<2x32xf32>
    %306 = arith.mulf %304, %287 : vector<2x32xf32>
    %307 = arith.mulf %303, %302 : vector<2x32xf32>
    %308 = arith.addf %306, %307 : vector<2x32xf32>
    %309 = math.tanh %308 : vector<2x32xf32>
    %310 = arith.mulf %305, %309 : vector<2x32xf32>
    %311 = vector.extract_strided_slice %223 {offsets = [8, 0], sizes = [2, 128], strides = [1, 1]} : vector<16x128xf32> to vector<2x128xf32>
    %312 = vector.extract_strided_slice %224 {offsets = [6, 0], sizes = [2, 128], strides = [1, 1]} : vector<16x128xf32> to vector<2x128xf32>
    %313 = arith.addf %311, %312 : vector<2x128xf32>
    %cst_63 = arith.constant dense<0.000000e+00> : vector<2x128xf32>
    %314 = tpu.matmul %310, %219, %cst_63 {dimension_numbers = #tpu.dot_dimension_numbers<[1], [0], [0], [1], [0, 0, 1, 1], [], []>} : vector<2x32xf32>, vector<32x128xf32>, vector<2x128xf32> -> vector<2x128xf32>
    %315 = arith.addf %313, %314 : vector<2x128xf32>
    %316 = vector.extract_strided_slice %315 {offsets = [0, 0], sizes = [2, 96], strides = [1, 1]} : vector<2x128xf32> to vector<2x96xf32>
    %317 = arith.negf %316 : vector<2x96xf32>
    %318 = math.exp %317 : vector<2x96xf32>
    %cst_64 = arith.constant 1.000000e+00 : f32
    %319 = vector.broadcast %cst_64 : f32 to vector<2x96xf32>
    %320 = arith.addf %319, %318 : vector<2x96xf32>
    %321 = arith.divf %319, %320 : vector<2x96xf32>
    %322 = vector.extract_strided_slice %315 {offsets = [0, 96], sizes = [2, 32], strides = [1, 1]} : vector<2x128xf32> to vector<2x32xf32>
    %323 = math.tanh %322 : vector<2x32xf32>
    %324 = vector.extract_strided_slice %321 {offsets = [0, 0], sizes = [2, 32], strides = [1, 1]} : vector<2x96xf32> to vector<2x32xf32>
    %325 = vector.extract_strided_slice %321 {offsets = [0, 32], sizes = [2, 32], strides = [1, 1]} : vector<2x96xf32> to vector<2x32xf32>
    %326 = vector.extract_strided_slice %321 {offsets = [0, 64], sizes = [2, 32], strides = [1, 1]} : vector<2x96xf32> to vector<2x32xf32>
    %327 = arith.mulf %325, %308 : vector<2x32xf32>
    %328 = arith.mulf %324, %323 : vector<2x32xf32>
    %329 = arith.addf %327, %328 : vector<2x32xf32>
    %330 = math.tanh %329 : vector<2x32xf32>
    %331 = arith.mulf %326, %330 : vector<2x32xf32>
    %332 = vector.extract_strided_slice %223 {offsets = [10, 0], sizes = [2, 128], strides = [1, 1]} : vector<16x128xf32> to vector<2x128xf32>
    %333 = vector.extract_strided_slice %224 {offsets = [4, 0], sizes = [2, 128], strides = [1, 1]} : vector<16x128xf32> to vector<2x128xf32>
    %334 = arith.addf %332, %333 : vector<2x128xf32>
    %cst_65 = arith.constant dense<0.000000e+00> : vector<2x128xf32>
    %335 = tpu.matmul %331, %219, %cst_65 {dimension_numbers = #tpu.dot_dimension_numbers<[1], [0], [0], [1], [0, 0, 1, 1], [], []>} : vector<2x32xf32>, vector<32x128xf32>, vector<2x128xf32> -> vector<2x128xf32>
    %336 = arith.addf %334, %335 : vector<2x128xf32>
    %337 = vector.extract_strided_slice %336 {offsets = [0, 0], sizes = [2, 96], strides = [1, 1]} : vector<2x128xf32> to vector<2x96xf32>
    %338 = arith.negf %337 : vector<2x96xf32>
    %339 = math.exp %338 : vector<2x96xf32>
    %cst_66 = arith.constant 1.000000e+00 : f32
    %340 = vector.broadcast %cst_66 : f32 to vector<2x96xf32>
    %341 = arith.addf %340, %339 : vector<2x96xf32>
    %342 = arith.divf %340, %341 : vector<2x96xf32>
    %343 = vector.extract_strided_slice %336 {offsets = [0, 96], sizes = [2, 32], strides = [1, 1]} : vector<2x128xf32> to vector<2x32xf32>
    %344 = math.tanh %343 : vector<2x32xf32>
    %345 = vector.extract_strided_slice %342 {offsets = [0, 0], sizes = [2, 32], strides = [1, 1]} : vector<2x96xf32> to vector<2x32xf32>
    %346 = vector.extract_strided_slice %342 {offsets = [0, 32], sizes = [2, 32], strides = [1, 1]} : vector<2x96xf32> to vector<2x32xf32>
    %347 = vector.extract_strided_slice %342 {offsets = [0, 64], sizes = [2, 32], strides = [1, 1]} : vector<2x96xf32> to vector<2x32xf32>
    %348 = arith.mulf %346, %329 : vector<2x32xf32>
    %349 = arith.mulf %345, %344 : vector<2x32xf32>
    %350 = arith.addf %348, %349 : vector<2x32xf32>
    %351 = math.tanh %350 : vector<2x32xf32>
    %352 = arith.mulf %347, %351 : vector<2x32xf32>
    %353 = vector.extract_strided_slice %223 {offsets = [12, 0], sizes = [2, 128], strides = [1, 1]} : vector<16x128xf32> to vector<2x128xf32>
    %354 = vector.extract_strided_slice %224 {offsets = [2, 0], sizes = [2, 128], strides = [1, 1]} : vector<16x128xf32> to vector<2x128xf32>
    %355 = arith.addf %353, %354 : vector<2x128xf32>
    %cst_67 = arith.constant dense<0.000000e+00> : vector<2x128xf32>
    %356 = tpu.matmul %352, %219, %cst_67 {dimension_numbers = #tpu.dot_dimension_numbers<[1], [0], [0], [1], [0, 0, 1, 1], [], []>} : vector<2x32xf32>, vector<32x128xf32>, vector<2x128xf32> -> vector<2x128xf32>
    %357 = arith.addf %355, %356 : vector<2x128xf32>
    %358 = vector.extract_strided_slice %357 {offsets = [0, 0], sizes = [2, 96], strides = [1, 1]} : vector<2x128xf32> to vector<2x96xf32>
    %359 = arith.negf %358 : vector<2x96xf32>
    %360 = math.exp %359 : vector<2x96xf32>
    %cst_68 = arith.constant 1.000000e+00 : f32
    %361 = vector.broadcast %cst_68 : f32 to vector<2x96xf32>
    %362 = arith.addf %361, %360 : vector<2x96xf32>
    %363 = arith.divf %361, %362 : vector<2x96xf32>
    %364 = vector.extract_strided_slice %357 {offsets = [0, 96], sizes = [2, 32], strides = [1, 1]} : vector<2x128xf32> to vector<2x32xf32>
    %365 = math.tanh %364 : vector<2x32xf32>
    %366 = vector.extract_strided_slice %363 {offsets = [0, 0], sizes = [2, 32], strides = [1, 1]} : vector<2x96xf32> to vector<2x32xf32>
    %367 = vector.extract_strided_slice %363 {offsets = [0, 32], sizes = [2, 32], strides = [1, 1]} : vector<2x96xf32> to vector<2x32xf32>
    %368 = vector.extract_strided_slice %363 {offsets = [0, 64], sizes = [2, 32], strides = [1, 1]} : vector<2x96xf32> to vector<2x32xf32>
    %369 = arith.mulf %367, %350 : vector<2x32xf32>
    %370 = arith.mulf %366, %365 : vector<2x32xf32>
    %371 = arith.addf %369, %370 : vector<2x32xf32>
    %372 = math.tanh %371 : vector<2x32xf32>
    %373 = arith.mulf %368, %372 : vector<2x32xf32>
    %374 = vector.extract_strided_slice %223 {offsets = [14, 0], sizes = [2, 128], strides = [1, 1]} : vector<16x128xf32> to vector<2x128xf32>
    %375 = vector.extract_strided_slice %224 {offsets = [0, 0], sizes = [2, 128], strides = [1, 1]} : vector<16x128xf32> to vector<2x128xf32>
    %376 = arith.addf %374, %375 : vector<2x128xf32>
    %cst_69 = arith.constant dense<0.000000e+00> : vector<2x128xf32>
    %377 = tpu.matmul %373, %219, %cst_69 {dimension_numbers = #tpu.dot_dimension_numbers<[1], [0], [0], [1], [0, 0, 1, 1], [], []>} : vector<2x32xf32>, vector<32x128xf32>, vector<2x128xf32> -> vector<2x128xf32>
    %378 = arith.addf %376, %377 : vector<2x128xf32>
    %379 = vector.extract_strided_slice %378 {offsets = [0, 0], sizes = [2, 96], strides = [1, 1]} : vector<2x128xf32> to vector<2x96xf32>
    %380 = arith.negf %379 : vector<2x96xf32>
    %381 = math.exp %380 : vector<2x96xf32>
    %cst_70 = arith.constant 1.000000e+00 : f32
    %382 = vector.broadcast %cst_70 : f32 to vector<2x96xf32>
    %383 = arith.addf %382, %381 : vector<2x96xf32>
    %384 = arith.divf %382, %383 : vector<2x96xf32>
    %385 = vector.extract_strided_slice %378 {offsets = [0, 96], sizes = [2, 32], strides = [1, 1]} : vector<2x128xf32> to vector<2x32xf32>
    %386 = math.tanh %385 : vector<2x32xf32>
    %387 = vector.extract_strided_slice %384 {offsets = [0, 0], sizes = [2, 32], strides = [1, 1]} : vector<2x96xf32> to vector<2x32xf32>
    %388 = vector.extract_strided_slice %384 {offsets = [0, 32], sizes = [2, 32], strides = [1, 1]} : vector<2x96xf32> to vector<2x32xf32>
    %389 = vector.extract_strided_slice %384 {offsets = [0, 64], sizes = [2, 32], strides = [1, 1]} : vector<2x96xf32> to vector<2x32xf32>
    %390 = arith.mulf %388, %371 : vector<2x32xf32>
    %391 = arith.mulf %387, %386 : vector<2x32xf32>
    %392 = arith.addf %390, %391 : vector<2x32xf32>
    %393 = math.tanh %392 : vector<2x32xf32>
    %394 = arith.mulf %389, %393 : vector<2x32xf32>
    %c0_71 = arith.constant 0 : index
    %c0_72 = arith.constant 0 : index
    %395 = vector.load %arg4[%c0_71, %c0_72] : memref<65x1xf32, #tpu.memory_space<vmem>>, vector<32x1xf32>
    %cst_73 = arith.constant dense<0.000000e+00> : vector<2x1xf32>
    %396 = tpu.matmul %394, %395, %cst_73 {dimension_numbers = #tpu.dot_dimension_numbers<[1], [0], [0], [1], [0, 0, 1, 1], [], []>} : vector<2x32xf32>, vector<32x1xf32>, vector<2x1xf32> -> vector<2x1xf32>
    %c32_74 = arith.constant 32 : index
    %c0_75 = arith.constant 0 : index
    %397 = vector.load %arg4[%c32_74, %c0_75] : memref<65x1xf32, #tpu.memory_space<vmem>>, vector<32x1xf32>
    %cst_76 = arith.constant dense<0.000000e+00> : vector<2x1xf32>
    %398 = tpu.matmul %247, %397, %cst_76 {dimension_numbers = #tpu.dot_dimension_numbers<[1], [0], [0], [1], [0, 0, 1, 1], [], []>} : vector<2x32xf32>, vector<32x1xf32>, vector<2x1xf32> -> vector<2x1xf32>
    %399 = arith.addf %396, %398 : vector<2x1xf32>
    %c64_77 = arith.constant 64 : index
    %c0_78 = arith.constant 0 : index
    %400 = vector.load %arg4[%c64_77, %c0_78] : memref<65x1xf32, #tpu.memory_space<vmem>>, vector<1x1xf32>
    %401 = vector.broadcast %400 : vector<1x1xf32> to vector<2x1xf32>
    %402 = arith.addf %399, %401 : vector<2x1xf32>
    %403 = arith.negf %402 : vector<2x1xf32>
    %404 = math.exp %403 : vector<2x1xf32>
    %cst_79 = arith.constant 1.000000e+00 : f32
    %405 = vector.broadcast %cst_79 : f32 to vector<2x1xf32>
    %406 = arith.addf %405, %404 : vector<2x1xf32>
    %407 = arith.divf %405, %406 : vector<2x1xf32>
    %c0_80 = arith.constant 0 : index
    %c0_81 = arith.constant 0 : index
    %408 = vector.load %arg5[%c0_80, %c0_81] : memref<2x1xf32, #tpu.memory_space<vmem>>, vector<2x1xf32>
    tpu.vector_store %arg5[%c0_80, %c0_81], %407 {strides = array<i32>} : memref<2x1xf32, #tpu.memory_space<vmem>>, vector<2x1xf32>,
    return
  }
}

</mosaic_0001>

<bundles_post_ra>
// kernel: eq.1
= control target key start
LH: loop header
LB: loop body
LE: loop exit
PB: predicated region body
PF: predicated region fallthrough
CT: control target
= control target key end

     0   :  { %s67_s10 = smov 14   ;;  %s68_s11 = smov 10   ;;  %vm3_vm0 = vcmask 15360   ;;  %vm9_vm1 = vcmask 130160   ;;  %vm15_vm2 = vcmask 113760   ;;  %vm21_vm3 = vcmask 97360   ;;  %s111_s0 = inlined_call_operand.vmem [shape: s32[8,2], index: 0, kind: input, shape index: {}]   ;;  %s112_s1 = inlined_call_operand.vmem [shape: s32[16], index: 1, kind: output, shape index: {}]  }
   0x1   :  { %v53_v0 = vld [vmem:[%s111_s0 + $0x7] sm:$0x1]   ;;  %v55_v1 = vld [vmem:[%s111_s0 + $0x5] sm:$0x1]   ;;  %v54_v2 = vld [vmem:[%s111_s0 + $0x6] sm:$0x1]  }
   0x2   :  { %7 = vrot.lane.b32.xlu0 %v53_v0, %s67_s10  ;;  %19 = vrot.lane.b32.xlu1 %v55_v1, %s68_s11  ;;  %v56_v3 = vld [vmem:[%s111_s0 + $0x4] sm:$0x1]   ;;  %v2_v4 = vld [vmem:[%s111_s0] sm:$0x1]   ;;  %s69_s18 = smov 12   ;;  %s70_s19 = smov 8  }
   0x3   :  { %4 = vst.msk [vmem:[#allocation0] sm:$0x1] %vm3_vm0, %v2_v4   ;;  %v57_v5 = vld [vmem:[%s111_s0 + $0x3] sm:$0x1]   ;;  %v58_v6 = vld [vmem:[%s111_s0 + $0x2] sm:$0x1]  }
   0x4   :  { %s71_s24 = smov 6   ;;  %s72_s25 = smov 4   ;;  %v59_v7 = vld [vmem:[%s111_s0 + $0x1] sm:$0x1]   ;;  %vm27_vm4 = vcmask 80960   ;;  %vm33_vm5 = vcmask 64560  }
   0x5   :  { %s73_s0 = smov 2   ;;  %vm39_vm6 = vcmask 48160   ;;  %vm45_vm7 = vcmask 31760  }
   0x6   :  { %13 = vrot.lane.b32.xlu0 %v54_v2, %s69_s18  ;;  %25 = vrot.lane.b32.xlu1 %v56_v3, %s70_s19 }
   0xa   :  { %31 = vrot.lane.b32.xlu0 %v57_v5, %s71_s24  ;;  %37 = vrot.lane.b32.xlu1 %v58_v6, %s72_s25 }
   0xe   :  { %43 = vrot.lane.b32.xlu0 %v59_v7, %s73_s0 }
  0x74   :  { %v8_v8 = vpop.permute.xlu0 %7   ;;  %v20_v9 = vpop.permute.xlu1 %19  }
  0x75   :  { %10 = vst.msk [vmem:[#allocation0] sm:$0x1] %vm9_vm1, %v8_v8  }
  0x78   :  { %v14_v10 = vpop.permute.xlu0 %13   ;;  %v26_v11 = vpop.permute.xlu1 %25  }
  0x79   :  { %16 = vst.msk [vmem:[#allocation0] sm:$0x1] %vm15_vm2, %v14_v10  }
  0x7a   :  { %22 = vst.msk [vmem:[#allocation0] sm:$0x1] %vm21_vm3, %v20_v9  }
  0x7b   :  { %28 = vst.msk [vmem:[#allocation0] sm:$0x1] %vm27_vm4, %v26_v11  }
  0x7c   :  { %v32_v12 = vpop.permute.xlu0 %31   ;;  %v38_v13 = vpop.permute.xlu1 %37  }
  0x7d   :  { %34 = vst.msk [vmem:[#allocation0] sm:$0x1] %vm33_vm5, %v32_v12  }
  0x7e   :  { %40 = vst.msk [vmem:[#allocation0] sm:$0x1] %vm39_vm6, %v38_v13  }
  0x80   :  { %v44_v14 = vpop.permute.xlu0 %43  }
  0x81   :  { %46 = vst.msk [vmem:[#allocation0] sm:$0x1] %vm45_vm7, %v44_v14  }
  0x88   :  { %v50_v15 = vld [vmem:[#allocation0] sm:$0x1] }
  0x89   :  { %52 = vst [vmem:[%s112_s1] sm:$0x1] %v50_v15 }

// kernel: lstm_layer_forward.1
= control target key start
LH: loop header
LB: loop body
LE: loop exit
PB: predicated region body
PF: predicated region fallthrough
CT: control target
= control target key end

     0   :  { %vm35_vm0 = vcmask 523264   ;;  %vm117_vm1 = vcmask 261120   ;;  %v2912_v34 = vmov 0.0   ;;  %v2913_v47 = vmov 0.0|0.0   ;;  %s2916_s17 = smov 64   ;;  %s3370_s1 = inlined_call_operand.vmem [shape: f32[67,32], index: 1, kind: input, shape index: {}]   ;;  %s3371_s0 = inlined_call_operand.vmem [shape: f32[16,64], index: 0, kind: input, shape index: {}]   ;;  %s3372_s2 = inlined_call_operand.vmem [shape: f32[65,256], index: 2, kind: input, shape index: {}]   ;;  %s3373_s3 = inlined_call_operand.vmem [shape: f32[65,256], index: 3, kind: input, shape index: {}]   ;;  %s3374_s4 = inlined_call_operand.vmem [shape: f32[65,1], index: 4, kind: input, shape index: {}]   ;;  %s3375_s5 = inlined_call_operand.vmem [shape: f32[2,1], index: 5, kind: output, shape index: {}]  }
   0x1   :  { %v22_v0 = vld [vmem:[%s3370_s1] sm:$0xff]  ;;  %v23_v1 = vld [vmem:[%s3370_s1 + $0x8] sm:$0xff]  ;;  %v24_v2 = vld [vmem:[%s3370_s1 + $0x10] sm:$0xff]  ;;  %237 = vmatprep.mubr.f32.mxu1 %v2912_v34  ;;  %vm2914_vm2 = vmmov 0   ;;  %vm363_vm3 = vcmask 254976   ;;  %vm475_vm4 = vcmask 257026  }
   0x2   :  { %v2631_v3 = vpack.c.bf16 %v23_v1, %v22_v0  ;;  %v25_v4 = vld [vmem:[%s3370_s1 + $0x18] sm:$0xff]  ;;  %v26_v6 = vld [vmem:[%s3370_s1 + $0x20] sm:$0xff]  ;;  %v27_v7 = vld [vmem:[%s3370_s1 + $0x28] sm:$0xff]  ;;  %vm699_vm5 = vcmask 261126   ;;  %vm587_vm6 = vcmask 259076   ;;  %vm2265_vm7 = vcmask 1024  }
   0x3   :  { %v2635_v5 = vpack.c.bf16 %v25_v4, %v24_v2  ;;  %v20_v8 = vld [vmem:[%s3371_s0] sm:$0xff]  ;;  %v2639_v9 = vpack.c.bf16 %v27_v7, %v26_v6  ;;  %v28_v10 = vld [vmem:[%s3370_s1 + $0x30] sm:$0xff]  ;;  %v29_v11 = vld [vmem:[%s3370_s1 + $0x38] sm:$0xff] }
   0x4   :  { %2632 = vmatprep.subr.bf16.mxu0 %v2631_v3  ;;  %2430 = vmatprep.mubr.msk.f32.mxu0 %vm35_vm0, %v20_v8  ;;  %v2643_v12 = vpack.c.bf16 %v29_v11, %v28_v10  ;;  %v21_v13 = vld [vmem:[%s3371_s0 + $0x8] sm:$0xff]  ;;  %v2271_v14 = vld [vmem:[%s3370_s1 + $0x40] ss:$0 sm:$0xff]  ;;  %v162_v32 = vld [vmem:[%s3372_s2 + $0x18] sm:$0xff] }
   0x5   :  { %2634 = vmatpush3.bf16.msra.mxu0 %v2631_v3  ;;  %v160_v31 = vld [vmem:[%s3372_s2 + $0x8] sm:$0xff]  ;;  %v159_v33 = vld [vmem:[%s3372_s2] sm:$0xff]  ;;  %v161_v36 = vld [vmem:[%s3372_s2 + $0x10] sm:$0xff] }
   0x6   :  { %2636 = vmatprep.subr.bf16.mxu0 %v2635_v5  ;;  %v2647_v35 = vpack.c.bf16 %v162_v32, %v160_v31  ;;  %v164_v37 = vld [vmem:[%s3372_s2 + $0x28] sm:$0xff]  ;;  %v166_v38 = vld [vmem:[%s3372_s2 + $0x38] sm:$0xff]  ;;  %v2649_v39 = vpack.c.bf16 %v161_v36, %v159_v33  ;;  %v163_v41 = vld [vmem:[%s3372_s2 + $0x20] sm:$0xff] }
   0x7   :  { %v2651_v40 = vpack.c.bf16 %v166_v38, %v164_v37  ;;  %v165_v42 = vld [vmem:[%s3372_s2 + $0x30] sm:$0xff]  ;;  %v250_v44 = vld [vmem:[%s3372_s2 + $0x40] sm:$0xff] }
   0x8   :  { %2648 = vmatprep.subr.bf16.mxu1 %v2647_v35  ;;  %v2653_v43 = vpack.c.bf16 %v165_v42, %v163_v41  ;;  %v251_v45 = vld [vmem:[%s3372_s2 + $0x50] sm:$0xff]  ;;  %v252_v48 = vld [vmem:[%s3372_s2 + $0x60] sm:$0xff] }
   0x9   :  { %2638 = vmatpush3.bf16.msra.mxu0 %v2635_v5  ;;  %2650 = vmatpush1.bf16.msra.mxu1 %v2649_v39  ;;  %v3017_v46 = vpack.c.bf16 %v251_v45, %v250_v44  ;;  %v253_v49 = vld [vmem:[%s3372_s2 + $0x70] sm:$0xff]  ;;  %v2274_v58 = vld [vmem:[%s3370_s1 + $0x41] ss:$0 sm:$0xff]  ;;  %v2275_v60 = vld [vmem:[%s3370_s1 + $0x42] ss:$0 sm:$0xff] }
   0xa   :  { %2640 = vmatprep.subr.bf16.mxu0 %v2639_v9  ;;  %2652 = vmatprep.subr.bf16.mxu1 %v2651_v40  ;;  %v3029_v50 = vpack.c.bf16 %v253_v49, %v252_v48  ;;  %v254_v5 = vld [vmem:[%s3372_s2 + $0x80] ss:$0 sm:$0xff]  ;;  %s2915_s2 = smov 32  }
   0xd   :  { %2642 = vmatpush3.bf16.msra.mxu0 %v2639_v9  ;;  %2654 = vmatpush1.bf16.msra.mxu1 %v2653_v43 }
   0xe   :  { %2644 = vmatprep.subr.bf16.mxu0 %v2643_v12  ;;  %2655 = vmatprep.subr.bf16.mxu1 %v2913_v47 }
  0x11   :  { %2646 = vmatpush3.bf16.msra.mxu0 %v2643_v12 }
  0x12   :  { %2661 = vmatprep.subr.bf16.mxu0 %v2913_v47 }
  0x14   :  { %2431 = vmatmul.mubr.msk.f32.vlgmr.msra.gmra.mrb[0].mxu0 %vm35_vm0, %v21_v13 }
  0x15   :  { %2663 = vmatpush3.bf16.msra.mxu0 %v3017_v46  ;;  %2452 = vmatprep.mubr.msk.f32.mxu0 %vm2914_vm2, %v2912_v34 }
  0x16   :  { %2664 = vmatprep.subr.bf16.mxu0 %v2913_v47 }
  0x19   :  { %2666 = vmatpush3.bf16.msra.mxu0 %v3029_v50 }
  0x1a   :  { %2673 = vmatprep.subr.bf16.mxu0 %v2913_v47 }
  0xe7   :  { %v2432_v15 = vpop.f32.mrb[0].mxu0 }
  0xe8   :  { %v108_v16 = vpop.f32.mrb[1].mxu0  ;;  %v114_v18 = vadd.f32 %v2432_v15, %v2271_v14 }
  0xe9   :  { %v109_v17 = vadd.f32 %v2271_v14, %v108_v16 }
  0xea   :  { %v121_v20 = vsel %vm117_vm1, %v114_v18, 0.0 }
  0xeb   :  { %v118_v19 = vsel %vm117_vm1, %v109_v17, 0.0 }
  0xec   :  { %119 = vadd.xlane.f32.xlu0 %v118_v19 }
  0xf0   :  { %122 = vadd.xlane.f32.xlu0 %v121_v20 }
 0x179   :  { %v120_v21 = vpop.xlane.xlu0 %119 }
 0x17a   :  { %v125_v22 = vmul.f32 0.03125, %v120_v21 }
 0x17c   :  { %v127_v23 = vsub.f32 %v109_v17, %v125_v22 }
 0x17d   :  { %v123_v24 = vpop.xlane.xlu0 %122 }
 0x17e   :  { %v126_v25 = vmul.f32 0.03125, %v123_v24  ;;  %v129_v26 = vmul.f32 %v127_v23, %v127_v23 }
 0x180   :  { %v128_v27 = vsub.f32 %v114_v18, %v126_v25  ;;  %v131_v28 = vsel %vm117_vm1, %v129_v26, 0.0 }
 0x181   :  { %132 = vadd.xlane.f32.xlu1 %v131_v28 }
 0x182   :  { %v130_v29 = vmul.f32 %v128_v27, %v128_v27 }
 0x184   :  { %v134_v30 = vsel %vm117_vm1, %v130_v29, 0.0 }
 0x185   :  { %135 = vadd.xlane.f32.xlu1 %v134_v30 }
 0x20e   :  { %v133_v51 = vpop.xlane.xlu1 %132 }
 0x20f   :  { %v137_v52 = vmul.f32 0.03125, %v133_v51 }
 0x211   :  { %v139_v53 = vadd.f32 1e-12, %v137_v52 }
 0x212   :  { %v136_v54 = vpop.xlane.xlu1 %135 }
 0x213   :  { %2776 = vrsqrt.f32 %v139_v53  ;;  %v138_v55 = vmul.f32 0.03125, %v136_v54 }
 0x215   :  { %v140_v56 = vadd.f32 1e-12, %v138_v55 }
 0x217   :  { %2778 = vrsqrt.f32 %v140_v56 }
 0x21d   :  { %v2777_v57 = vpop.eup %2776 }
 0x21e   :  { %v143_v59 = vmul.f32 %v2777_v57, %v127_v23 }
 0x220   :  { %v150_v61 = vmul.f32 %v2274_v58, %v143_v59 }
 0x221   :  { %v2779_v62 = vpop.eup %2778 }
 0x222   :  { %v157_v63 = vadd.f32 %v2275_v60, %v150_v61  ;;  %v144_v0 = vmul.f32 %v2779_v62, %v128_v27 }
 0x224   :  { %2276 = vmatmul.mubr.msk.f32.vlgmr.msra.gmra.mrb[0].mxu1 %vm117_vm1, %v157_v63  ;;  %v151_v1 = vmul.f32 %v2274_v58, %v144_v0 }
 0x225   :  { %2657 = vmatpush3.bf16.msra.mxu1 %v3017_v46  ;;  %243 = vmatprep.mubr.f32.mxu1 %v2912_v34 }
 0x226   :  { %v158_v2 = vadd.f32 %v2275_v60, %v151_v1  ;;  %2658 = vmatprep.subr.bf16.mxu1 %v2913_v47 }
 0x228   :  { %2277 = vmatmul.mubr.msk.f32.gmra.mrb[2].mxu1 %vm117_vm1, %v158_v2 }
 0x229   :  { %2660 = vmatpush3.bf16.msra.mxu1 %v3029_v50  ;;  %2441 = vmatprep.mubr.msk.f32.mxu1 %vm2914_vm2, %v2912_v34 }
 0x22a   :  { %2667 = vmatprep.subr.bf16.mxu1 %v2913_v47 }
 0x22c   :  { %2442 = vmatmul.mubr.f32.vlgmr.msra.gmra.mrb[4].mxu1 %v2912_v34 }
 0x22d   :  { %2669 = vmatpush3.bf16.msra.mxu1 %v3017_v46  ;;  %2463 = vmatprep.mubr.msk.f32.mxu1 %vm2914_vm2, %v2912_v34 }
 0x22e   :  { %2670 = vmatprep.subr.bf16.mxu1 %v2913_v47 }
 0x231   :  { %2672 = vmatpush3.bf16.msra.mxu1 %v3029_v50 }
 0x232   :  { %2679 = vmatprep.subr.bf16.mxu1 %v2913_v47 }
 0x2f7   :  { %v239_v3 = vpop.f32.mrb[0].mxu1 }
 0x2f8   :  { %v241_v4 = vpop.f32.mrb[1].mxu1  ;;  %v255_v11 = vadd.f32 %v254_v5, %v239_v3 }
 0x2f9   :  { %v702_v7 = vrot.slane %v241_v4, 6  ;;  %v813_v8 = vrot.slane %v241_v4, 2 }
 0x2fb   :  { %v245_v6 = vpop.f32.mrb[2].mxu1 }
 0x2fc   :  { %v256_v9 = vadd.f32 %v254_v5, %v245_v6  ;;  %v247_v10 = vpop.f32.mrb[3].mxu1 }
 0x2fd   :  { %v258_v12 = vrot.slane %v247_v10, 6  ;;  %v365_v13 = vrot.slane %v247_v10, 2 }
 0x2fe   :  { %v3060_v14 = vadd.f32 %v813_v8, %v256_v9  ;;  %v3062_v15 = vadd.f32 %v702_v7, %v256_v9 }
 0x2ff   :  { %v3064_v16 = vadd.f32 %v365_v13, %v255_v11  ;;  %v3066_v17 = vadd.f32 %v258_v12, %v255_v11  ;;  %v330_v18 = vpop.f32.mrb[4].mxu1 }
 0x300   :  { %v2443_v19 = vpop.f32.mrb[5].mxu1 }
 0x301   :  { %v334_v20 = vadd.f32 %v330_v18, %v3066_v17 }
 0x303   :  { %2780 = vtanh.f32 %v334_v20  ;;  %v2278_v22 = vmul.f32 -1.442695, %v334_v20 }
 0x305   :  { %2782 = vpow2.f32 %v2278_v22 }
 0x30d   :  { %v2781_v21 = vpop.eup %2780 }
 0x30e   :  { %344 = vrot.lane.b32.xlu0 %v2781_v21, %s2915_s2 }
 0x30f   :  { %v2783_v23 = vpop.eup %2782 }
 0x310   :  { %v338_v24 = vadd.f32 1.0, %v2783_v23 }
 0x312   :  { %2784 = vrcp.f32 %v338_v24 }
 0x31c   :  { %v2785_v25 = vpop.eup %2784 }
 0x31d   :  { %v342_v28 = vmul.f32 0.0, %v2785_v25 }
 0x380   :  { %v345_v26 = vpop.permute.xlu0 %344 }
 0x381   :  { %v347_v27 = vmul.f32 %v2785_v25, %v345_v26 }
 0x383   :  { %349 = vrot.lane.b32.xlu1 %v347_v27, %s2915_s2 }
 0x3f5   :  { %v350_v29 = vpop.permute.xlu1 %349 }
 0x3f6   :  { %v352_v30 = vadd.f32 %v350_v29, %v342_v28 }
 0x3f8   :  { %2786 = vtanh.f32 %v352_v30  ;;  %v452_v49 = vrot.slane %v352_v30, 6 }
 0x402   :  { %v2787_v31 = vpop.eup %2786 }
 0x403   :  { %355 = vrot.lane.b32.xlu1 %v2787_v31, %s2915_s2 }
 0x475   :  { %v356_v32 = vpop.permute.xlu1 %355 }
 0x476   :  { %v358_v33 = vmul.f32 %v2785_v25, %v356_v32 }
 0x478   :  { %360 = vrot.lane.b32.xlu1 %v358_v33, %s2916_s17 }
 0x4ea   :  { %v361_v35 = vpop.permute.xlu1 %360 }
 0x4eb   :  { %364 = vst.msk [vmem:[#allocation2] sm:$0x3] %vm363_vm3, %v361_v35  ;;  %2453 = vmatmul.mubr.msk.f32.vlgmr.msra.gmra.mrb[2].mxu0 %vm117_vm1, %v361_v35 }
 0x4ec   :  { %2675 = vmatpush3.bf16.msra.mxu0 %v3017_v46  ;;  %2474 = vmatprep.mubr.msk.f32.mxu0 %vm2914_vm2, %v2912_v34 }
 0x4ed   :  { %2676 = vmatprep.subr.bf16.mxu0 %v2913_v47 }
 0x4f0   :  { %2678 = vmatpush3.bf16.msra.mxu0 %v3029_v50 }
 0x4f1   :  { %2685 = vmatprep.subr.bf16.mxu0 %v2913_v47 }
 0x5be   :  { %v436_v36 = vpop.f32.mrb[2].mxu0 }
 0x5bf   :  { %v441_v37 = vrot.slane %v436_v36, 6  ;;  %v2454_v38 = vpop.f32.mrb[3].mxu0 }
 0x5c1   :  { %v443_v39 = vadd.f32 %v441_v37, %v3064_v16 }
 0x5c3   :  { %2788 = vtanh.f32 %v443_v39  ;;  %v2280_v41 = vmul.f32 -1.442695, %v443_v39 }
 0x5c5   :  { %2790 = vpow2.f32 %v2280_v41 }
 0x5cd   :  { %v2789_v40 = vpop.eup %2788 }
 0x5ce   :  { %456 = vrot.lane.b32.xlu0 %v2789_v40, %s2915_s2 }
 0x5cf   :  { %v2791_v42 = vpop.eup %2790 }
 0x5d0   :  { %v447_v43 = vadd.f32 1.0, %v2791_v42 }
 0x5d2   :  { %2792 = vrcp.f32 %v447_v43 }
 0x5dc   :  { %v2793_v44 = vpop.eup %2792 }
 0x5dd   :  { %v454_v51 = vmul.f32 %v2793_v44, %v452_v49 }
 0x640   :  { %v457_v45 = vpop.permute.xlu0 %456 }
 0x641   :  { %v459_v48 = vmul.f32 %v2793_v44, %v457_v45 }
 0x643   :  { %461 = vrot.lane.b32.xlu1 %v459_v48, %s2915_s2 }
 0x6b5   :  { %v462_v52 = vpop.permute.xlu1 %461 }
 0x6b6   :  { %v464_v53 = vadd.f32 %v462_v52, %v454_v51 }
 0x6b8   :  { %2794 = vtanh.f32 %v464_v53  ;;  %v564_v6 = vrot.slane %v464_v53, 6 }
 0x6c2   :  { %v2795_v54 = vpop.eup %2794 }
 0x6c3   :  { %467 = vrot.lane.b32.xlu0 %v2795_v54, %s2915_s2 }
 0x735   :  { %v468_v55 = vpop.permute.xlu0 %467 }
 0x736   :  { %v3085_v56 = vmul.f32 %v2793_v44, %v468_v55 }
 0x738   :  { %v477_v57 = vrot.slane %v3085_v56, 2 }
 0x73a   :  { %478 = vrot.lane.b32.xlu1 %v477_v57, %s2916_s17 }
 0x7ac   :  { %v479_v58 = vpop.permute.xlu1 %478 }
 0x7ad   :  { %2464 = vmatmul.mubr.msk.f32.vlgmr.msra.gmra.mrb[6].mxu1 %vm117_vm1, %v479_v58 }
 0x7ae   :  { %2681 = vmatpush3.bf16.msra.mxu1 %v3017_v46  ;;  %2485 = vmatprep.mubr.msk.f32.mxu1 %vm2914_vm2, %v2912_v34 }
 0x7af   :  { %2682 = vmatprep.subr.bf16.mxu1 %v2913_v47 }
 0x7b2   :  { %2684 = vmatpush3.bf16.msra.mxu1 %v3029_v50 }
 0x7b3   :  { %2691 = vmatprep.subr.bf16.mxu1 %v2913_v47 }
 0x880   :  { %v548_v59 = vpop.f32.mrb[6].mxu1 }
 0x881   :  { %v553_v60 = vrot.slane %v548_v59, 4  ;;  %v2465_v61 = vpop.f32.mrb[7].mxu1 }
 0x883   :  { %v555_v62 = vadd.f32 %v553_v60, %v3066_v17 }
 0x885   :  { %2796 = vtanh.f32 %v555_v62  ;;  %v2282_v0 = vmul.f32 -1.442695, %v555_v62 }
 0x887   :  { %2798 = vpow2.f32 %v2282_v0 }
 0x88f   :  { %v2797_v63 = vpop.eup %2796 }
 0x890   :  { %568 = vrot.lane.b32.xlu0 %v2797_v63, %s2915_s2 }
 0x891   :  { %v2799_v1 = vpop.eup %2798 }
 0x892   :  { %v559_v2 = vadd.f32 1.0, %v2799_v1 }
 0x894   :  { %2800 = vrcp.f32 %v559_v2 }
 0x89e   :  { %v2801_v3 = vpop.eup %2800 }
 0x89f   :  { %v566_v7 = vmul.f32 %v2801_v3, %v564_v6 }
 0x902   :  { %v569_v4 = vpop.permute.xlu0 %568 }
 0x903   :  { %v571_v5 = vmul.f32 %v2801_v3, %v569_v4 }
 0x905   :  { %573 = vrot.lane.b32.xlu1 %v571_v5, %s2915_s2 }
 0x977   :  { %v574_v8 = vpop.permute.xlu1 %573 }
 0x978   :  { %v576_v9 = vadd.f32 %v574_v8, %v566_v7 }
 0x97a   :  { %2802 = vtanh.f32 %v576_v9  ;;  %v676_v29 = vrot.slane %v576_v9, 6 }
 0x984   :  { %v2803_v10 = vpop.eup %2802 }
 0x985   :  { %579 = vrot.lane.b32.xlu0 %v2803_v10, %s2915_s2 }
 0x9f7   :  { %v580_v11 = vpop.permute.xlu0 %579 }
 0x9f8   :  { %v3100_v12 = vmul.f32 %v2801_v3, %v580_v11 }
 0x9fa   :  { %v589_v13 = vrot.slane %v3100_v12, 4 }
 0x9fc   :  { %590 = vrot.lane.b32.xlu1 %v589_v13, %s2916_s17 }
 0xa6e   :  { %v591_v17 = vpop.permute.xlu1 %590 }
 0xa6f   :  { %2475 = vmatmul.mubr.msk.f32.vlgmr.msra.gmra.mrb[4].mxu0 %vm117_vm1, %v591_v17 }
 0xa70   :  { %2687 = vmatpush3.bf16.msra.mxu0 %v3017_v46  ;;  %2496 = vmatprep.mubr.msk.f32.mxu0 %vm2914_vm2, %v2912_v34 }
 0xa71   :  { %2688 = vmatprep.subr.bf16.mxu0 %v2913_v47 }
 0xa74   :  { %2690 = vmatpush3.bf16.msra.mxu0 %v3029_v50 }
 0xa75   :  { %2697 = vmatprep.subr.bf16.mxu0 %v2913_v47 }
 0xb42   :  { %v660_v18 = vpop.f32.mrb[4].mxu0 }
 0xb43   :  { %v665_v19 = vrot.slane %v660_v18, 2  ;;  %v2476_v20 = vpop.f32.mrb[5].mxu0 }
 0xb45   :  { %v667_v21 = vadd.f32 %v665_v19, %v3064_v16 }
 0xb47   :  { %2804 = vtanh.f32 %v667_v21  ;;  %v2284_v23 = vmul.f32 -1.442695, %v667_v21 }
 0xb49   :  { %2806 = vpow2.f32 %v2284_v23 }
 0xb51   :  { %v2805_v22 = vpop.eup %2804 }
 0xb52   :  { %680 = vrot.lane.b32.xlu0 %v2805_v22, %s2915_s2 }
 0xb53   :  { %v2807_v24 = vpop.eup %2806 }
 0xb54   :  { %v671_v25 = vadd.f32 1.0, %v2807_v24 }
 0xb56   :  { %2808 = vrcp.f32 %v671_v25 }
 0xb60   :  { %v2809_v26 = vpop.eup %2808 }
 0xb61   :  { %v678_v30 = vmul.f32 %v2809_v26, %v676_v29 }
 0xbc4   :  { %v681_v27 = vpop.permute.xlu0 %680 }
 0xbc5   :  { %v683_v28 = vmul.f32 %v2809_v26, %v681_v27 }
 0xbc7   :  { %685 = vrot.lane.b32.xlu1 %v683_v28, %s2915_s2 }
 0xc39   :  { %v686_v31 = vpop.permute.xlu1 %685 }
 0xc3a   :  { %v688_v32 = vadd.f32 %v686_v31, %v678_v30 }
 0xc3c   :  { %2810 = vtanh.f32 %v688_v32  ;;  %v789_v51 = vrot.slane %v688_v32, 6 }
 0xc46   :  { %v2811_v16 = vpop.eup %2810 }
 0xc47   :  { %691 = vrot.lane.b32.xlu0 %v2811_v16, %s2915_s2 }
 0xcb9   :  { %v692_v33 = vpop.permute.xlu0 %691 }
 0xcba   :  { %v3115_v35 = vmul.f32 %v2809_v26, %v692_v33 }
 0xcbc   :  { %v705_v36 = vrot.slane %v3115_v35, 6 }
 0xcbe   :  { %706 = vrot.lane.b32.xlu1 %v705_v36, %s2916_s17 }
 0xd30   :  { %v707_v37 = vpop.permute.xlu1 %706 }
 0xd31   :  { %2486 = vmatmul.mubr.msk.f32.vlgmr.msra.gmra.mrb[8].mxu1 %vm117_vm1, %v707_v37 }
 0xd32   :  { %2693 = vmatpush3.bf16.msra.mxu1 %v3017_v46  ;;  %2507 = vmatprep.mubr.msk.f32.mxu1 %vm2914_vm2, %v2912_v34 }
 0xd33   :  { %2694 = vmatprep.subr.bf16.mxu1 %v2913_v47 }
 0xd36   :  { %2696 = vmatpush3.bf16.msra.mxu1 %v3029_v50 }
 0xe04   :  { %v776_v38 = vpop.f32.mrb[8].mxu1 }
 0xe05   :  { %v780_v39 = vadd.f32 %v776_v38, %v3062_v15  ;;  %v2487_v40 = vpop.f32.mrb[9].mxu1 }
 0xe07   :  { %2812 = vtanh.f32 %v780_v39  ;;  %v2286_v42 = vmul.f32 -1.442695, %v780_v39 }
 0xe09   :  { %2814 = vpow2.f32 %v2286_v42 }
 0xe11   :  { %v2813_v41 = vpop.eup %2812 }
 0xe12   :  { %793 = vrot.lane.b32.xlu0 %v2813_v41, %s2915_s2 }
 0xe13   :  { %v2815_v43 = vpop.eup %2814 }
 0xe14   :  { %v784_v44 = vadd.f32 1.0, %v2815_v43 }
 0xe16   :  { %2816 = vrcp.f32 %v784_v44 }
 0xe20   :  { %v2817_v45 = vpop.eup %2816 }
 0xe21   :  { %v791_v52 = vmul.f32 %v2817_v45, %v789_v51 }
 0xe84   :  { %v794_v48 = vpop.permute.xlu0 %793 }
 0xe85   :  { %v796_v49 = vmul.f32 %v2817_v45, %v794_v48 }
 0xe87   :  { %798 = vrot.lane.b32.xlu1 %v796_v49, %s2915_s2 }
 0xef9   :  { %v799_v53 = vpop.permute.xlu1 %798 }
 0xefa   :  { %v801_v54 = vadd.f32 %v799_v53, %v791_v52 }
 0xefc   :  { %2818 = vtanh.f32 %v801_v54 }
 0xf06   :  { %v2819_v55 = vpop.eup %2818 }
 0xf07   :  { %804 = vrot.lane.b32.xlu0 %v2819_v55, %s2915_s2  ;;  %v1149_v55 = vld [vmem:[%s3373_s3 + $0x8] sm:$0xff] }
 0xf79   :  { %v805_v57 = vpop.permute.xlu0 %804 }
 0xf7a   :  { %v807_v58 = vmul.f32 %v2817_v45, %v805_v57  ;;  %v1151_v57 = vld [vmem:[%s3373_s3 + $0x18] sm:$0xff] }
 0xf7c   :  { %809 = vrot.lane.b32.xlu1 %v807_v58, %s2916_s17  ;;  %v1150_v58 = vld [vmem:[%s3373_s3 + $0x10] sm:$0xff] }
 0xfee   :  { %v810_v59 = vpop.permute.xlu1 %809 }
 0xfef   :  { %812 = vst.msk [vmem:[#allocation2 + $0x8] sm:$0x3] %vm363_vm3, %v810_v59  ;;  %2497 = vmatmul.mubr.msk.f32.vlgmr.msra.gmra.mrb[6].mxu0 %vm117_vm1, %v810_v59 }
 0xff0   :  { %2699 = vmatpush3.bf16.msra.mxu0 %v3017_v46  ;;  %2518 = vmatprep.mubr.msk.f32.mxu0 %vm2914_vm2, %v2912_v34 }
 0xff1   :  { %2700 = vmatprep.subr.bf16.mxu0 %v2913_v47 }
 0xff4   :  { %2702 = vmatpush3.bf16.msra.mxu0 %v3029_v50  ;;  %v900_v50 = vrot.slane %v801_v54, 6 }
 0xff5   :  { %2711 = vmatprep.subr.bf16.mxu0 %v2913_v47 }
0x10c2   :  { %v884_v60 = vpop.f32.mrb[6].mxu0 }
0x10c3   :  { %v889_v61 = vrot.slane %v884_v60, 6  ;;  %v2498_v62 = vpop.f32.mrb[7].mxu0 }
0x10c4   :  { %v1155_v62 = vld [vmem:[%s3373_s3 + $0x38] sm:$0xff] }
0x10c5   :  { %v891_v63 = vadd.f32 %v889_v61, %v3060_v14  ;;  %v1153_v61 = vld [vmem:[%s3373_s3 + $0x28] sm:$0xff] }
0x10c7   :  { %2820 = vtanh.f32 %v891_v63  ;;  %v2288_v1 = vmul.f32 -1.442695, %v891_v63  ;;  %v2707_v63 = vpack.c.bf16 %v1155_v62, %v1153_v61 }
0x10c9   :  { %2822 = vpow2.f32 %v2288_v1  ;;  %v1154_v1 = vld [vmem:[%s3373_s3 + $0x30] sm:$0xff] }
0x10d1   :  { %v2821_v0 = vpop.eup %2820 }
0x10d2   :  { %904 = vrot.lane.b32.xlu0 %v2821_v0, %s2915_s2  ;;  %v1152_v0 = vld [vmem:[%s3373_s3 + $0x20] sm:$0xff] }
0x10d3   :  { %v2823_v46 = vpop.eup %2822 }
0x10d4   :  { %v895_v2 = vadd.f32 1.0, %v2823_v46 }
0x10d6   :  { %2824 = vrcp.f32 %v895_v2  ;;  %v2709_v2 = vpack.c.bf16 %v1154_v1, %v1152_v0 }
0x10e0   :  { %v2825_v3 = vpop.eup %2824 }
0x10e1   :  { %v902_v6 = vmul.f32 %v2825_v3, %v900_v50  ;;  %v1240_v50 = vld [vmem:[%s3373_s3 + $0x50] sm:$0xff] }
0x1144   :  { %v905_v4 = vpop.permute.xlu0 %904 }
0x1145   :  { %v907_v5 = vmul.f32 %v2825_v3, %v905_v4 }
0x1147   :  { %909 = vrot.lane.b32.xlu1 %v907_v5, %s2915_s2  ;;  %v1239_v5 = vld [vmem:[%s3373_s3 + $0x40] sm:$0xff] }
0x11b9   :  { %v910_v7 = vpop.permute.xlu1 %909 }
0x11ba   :  { %v912_v8 = vadd.f32 %v910_v7, %v902_v6  ;;  %v3203_v6 = vpack.c.bf16 %v1240_v50, %v1239_v5  ;;  %v1242_v7 = vld [vmem:[%s3373_s3 + $0x70] sm:$0xff] }
0x11bc   :  { %2826 = vtanh.f32 %v912_v8  ;;  %v1011_v29 = vrot.slane %v912_v8, 6 }
0x11c6   :  { %v2827_v9 = vpop.eup %2826 }
0x11c7   :  { %915 = vrot.lane.b32.xlu0 %v2827_v9, %s2915_s2 }
0x1239   :  { %v916_v10 = vpop.permute.xlu0 %915 }
0x123a   :  { %v3142_v11 = vmul.f32 %v2825_v3, %v916_v10 }
0x123c   :  { %v924_v13 = vrot.slane %v3142_v11, 2 }
0x123e   :  { %925 = vrot.lane.b32.xlu1 %v924_v13, %s2916_s17 }
0x12b0   :  { %v926_v17 = vpop.permute.xlu1 %925 }
0x12b1   :  { %2508 = vmatmul.mubr.msk.f32.vlgmr.msra.gmra.mrb[10].mxu1 %vm117_vm1, %v926_v17 }
0x12b2   :  { %1226 = vmatprep.mubr.f32.mxu1 %v2912_v34 }
0x1384   :  { %v995_v18 = vpop.f32.mrb[10].mxu1 }
0x1385   :  { %v1000_v19 = vrot.slane %v995_v18, 4  ;;  %v2509_v20 = vpop.f32.mrb[11].mxu1 }
0x1387   :  { %v1002_v21 = vadd.f32 %v1000_v19, %v3062_v15 }
0x1389   :  { %2828 = vtanh.f32 %v1002_v21  ;;  %v2290_v23 = vmul.f32 -1.442695, %v1002_v21 }
0x138b   :  { %2830 = vpow2.f32 %v2290_v23 }
0x1393   :  { %v2829_v22 = vpop.eup %2828 }
0x1394   :  { %1015 = vrot.lane.b32.xlu0 %v2829_v22, %s2915_s2 }
0x1395   :  { %v2831_v24 = vpop.eup %2830 }
0x1396   :  { %v1006_v25 = vadd.f32 1.0, %v2831_v24  ;;  %v1243_v24 = vld [vmem:[%s3373_s3 + $0x80] ss:$0 sm:$0xff] }
0x1398   :  { %2832 = vrcp.f32 %v1006_v25 }
0x13a2   :  { %v2833_v26 = vpop.eup %2832 }
0x13a3   :  { %v1013_v30 = vmul.f32 %v2833_v26, %v1011_v29 }
0x1406   :  { %v1016_v27 = vpop.permute.xlu0 %1015 }
0x1407   :  { %v1018_v28 = vmul.f32 %v2833_v26, %v1016_v27 }
0x1409   :  { %1020 = vrot.lane.b32.xlu1 %v1018_v28, %s2915_s2 }
0x147b   :  { %v1021_v31 = vpop.permute.xlu1 %1020 }
0x147c   :  { %v1023_v32 = vadd.f32 %v1021_v31, %v1013_v30 }
0x147e   :  { %2834 = vtanh.f32 %v1023_v32 }
0x1488   :  { %v2835_v15 = vpop.eup %2834 }
0x1489   :  { %1026 = vrot.lane.b32.xlu0 %v2835_v15, %s2915_s2 }
0x14fb   :  { %v1027_v16 = vpop.permute.xlu0 %1026 }
0x14fc   :  { %v1029_v33 = vmul.f32 %v2833_v26, %v1027_v16 }
0x14fe   :  { %v1035_v36 = vrot.slane %v1029_v33, 4 }
0x1500   :  { %1036 = vrot.lane.b32.xlu1 %v1035_v36, %s2916_s17 }
0x1572   :  { %v1037_v37 = vpop.permute.xlu1 %1036 }
0x1573   :  { %2519 = vmatmul.mubr.msk.f32.vlgmr.msra.gmra.mrb[8].mxu0 %vm117_vm1, %v1037_v37 }
0x1574   :  { %2529 = vmatprep.mubr.msk.f32.mxu0 %vm2914_vm2, %v2912_v34  ;;  %2713 = vmatpush3.bf16.msra.mxu0 %v3203_v6 }
0x1575   :  { %2714 = vmatprep.subr.bf16.mxu0 %v2913_v47 }
0x1646   :  { %v1106_v38 = vpop.f32.mrb[8].mxu0 }
0x1647   :  { %v1111_v39 = vrot.slane %v1106_v38, 2  ;;  %v2520_v40 = vpop.f32.mrb[9].mxu0 }
0x1649   :  { %v1113_v41 = vadd.f32 %v1111_v39, %v3060_v14  ;;  %v1122_v14 = vrot.slane %v1023_v32, 6 }
0x164b   :  { %2836 = vtanh.f32 %v1113_v41  ;;  %v2292_v43 = vmul.f32 -1.442695, %v1113_v41 }
0x164d   :  { %2838 = vpow2.f32 %v2292_v43 }
0x1655   :  { %v2837_v42 = vpop.eup %2836 }
0x1656   :  { %1126 = vrot.lane.b32.xlu0 %v2837_v42, %s2915_s2 }
0x1657   :  { %v2839_v44 = vpop.eup %2838 }
0x1658   :  { %v1117_v45 = vadd.f32 1.0, %v2839_v44 }
0x165a   :  { %2840 = vrcp.f32 %v1117_v45 }
0x1664   :  { %v2841_v48 = vpop.eup %2840 }
0x1665   :  { %v1124_v52 = vmul.f32 %v2841_v48, %v1122_v14 }
0x16c8   :  { %v1127_v49 = vpop.permute.xlu0 %1126 }
0x16c9   :  { %v1129_v51 = vmul.f32 %v2841_v48, %v1127_v49 }
0x16cb   :  { %1131 = vrot.lane.b32.xlu1 %v1129_v51, %s2915_s2 }
0x16cf   :  { %472 = vrot.lane.b32.xlu1 %v3085_v56, %s2916_s17  ;;  %v2703_v56 = vpack.c.bf16 %v1151_v57, %v1149_v55 }
0x16d1   :  { %2704 = vmatprep.subr.bf16.mxu1 %v2703_v56 }
0x16d3   :  { %696 = vrot.lane.b32.xlu1 %v3115_v35, %s2916_s17  ;;  %v1148_v35 = vld [vmem:[%s3373_s3] sm:$0xff] }
0x16d4   :  { %v2705_v60 = vpack.c.bf16 %v1150_v58, %v1148_v35 }
0x16d6   :  { %2706 = vmatpush1.bf16.msra.mxu1 %v2705_v60 }
0x16d7   :  { %1031 = vrot.lane.b32.xlu1 %v1029_v33, %s2916_s17  ;;  %2708 = vmatprep.subr.bf16.mxu1 %v2707_v63 }
0x16da   :  { %2710 = vmatpush1.bf16.msra.mxu1 %v2709_v2 }
0x16db   :  { %2717 = vmatprep.subr.bf16.mxu1 %v2913_v47 }
0x173d   :  { %v1132_v53 = vpop.permute.xlu1 %1131 }
0x173e   :  { %v1134_v54 = vadd.f32 %v1132_v53, %v1124_v52 }
0x1740   :  { %2842 = vtanh.f32 %v1134_v54 }
0x1741   :  { %v473_v59 = vpop.permute.xlu1 %472 }
0x1742   :  { %476 = vst.msk [vmem:[#allocation2] sm:$0xc] %vm475_vm4, %v473_v59 }
0x1745   :  { %v697_v46 = vpop.permute.xlu1 %696 }
0x1746   :  { %700 = vst.msk [vmem:[#allocation2] sm:$0xc0] %vm699_vm5, %v697_v46 }
0x1749   :  { %v1032_v3 = vpop.permute.xlu1 %1031 }
0x174a   :  { %v2843_v4 = vpop.eup %2842  ;;  %1034 = vst.msk [vmem:[#allocation2 + $0x8] sm:$0x30] %vm587_vm6, %v1032_v3 }
0x174b   :  { %1137 = vrot.lane.b32.xlu0 %v2843_v4, %s2915_s2 }
0x174f   :  { %584 = vrot.lane.b32.xlu0 %v3100_v12, %s2916_s17  ;;  %v1241_v12 = vld [vmem:[%s3373_s3 + $0x60] sm:$0xff] }
0x1750   :  { %v3213_v8 = vpack.c.bf16 %v1242_v7, %v1241_v12 }
0x1752   :  { %2716 = vmatpush3.bf16.msra.mxu0 %v3213_v8 }
0x1753   :  { %920 = vrot.lane.b32.xlu0 %v3142_v11, %s2916_s17  ;;  %2723 = vmatprep.subr.bf16.mxu0 %v2913_v47 }
0x1755   :  { %2530 = vmatmul.mubr.f32.vlgmr.msra.gmra.mrb[10].mxu0 %v2912_v34 }
0x1756   :  { %2725 = vmatpush3.bf16.msra.mxu0 %v3203_v6  ;;  %2551 = vmatprep.mubr.msk.f32.mxu0 %vm2914_vm2, %v2912_v34 }
0x1757   :  { %2726 = vmatprep.subr.bf16.mxu0 %v2913_v47 }
0x175a   :  { %2728 = vmatpush3.bf16.msra.mxu0 %v3213_v8 }
0x175b   :  { %2735 = vmatprep.subr.bf16.mxu0 %v2913_v47 }
0x17bd   :  { %v1138_v9 = vpop.permute.xlu0 %1137 }
0x17be   :  { %v1140_v10 = vmul.f32 %v2841_v48, %v1138_v9 }
0x17c0   :  { %1142 = vrot.lane.b32.xlu0 %v1140_v10, %s2916_s17 }
0x17c1   :  { %v585_v11 = vpop.permute.xlu0 %584 }
0x17c2   :  { %588 = vst.msk [vmem:[#allocation2] sm:$0x30] %vm587_vm6, %v585_v11 }
0x17c5   :  { %v921_v13 = vpop.permute.xlu0 %920 }
0x17c6   :  { %923 = vst.msk [vmem:[#allocation2 + $0x8] sm:$0xc] %vm475_vm4, %v921_v13 }
0x17c9   :  { %v1146_v17 = vld [vmem:[#allocation2] sm:$0xff] }
0x17ca   :  { %2293 = vmatmul.mubr.msk.f32.vlgmr.msra.gmra.mrb[12].mxu1 %vm117_vm1, %v1146_v17 }
0x17cb   :  { %1232 = vmatprep.mubr.f32.mxu1 %v2912_v34  ;;  %2719 = vmatpush3.bf16.msra.mxu1 %v3203_v6 }
0x17cc   :  { %2720 = vmatprep.subr.bf16.mxu1 %v2913_v47 }
0x17cf   :  { %2722 = vmatpush3.bf16.msra.mxu1 %v3213_v8 }
0x17d0   :  { %2729 = vmatprep.subr.bf16.mxu1 %v2913_v47 }
0x1828   :  { %v1316_v20 = vpop.f32.mrb[10].mxu0 }
0x1829   :  { %v2531_v21 = vpop.f32.mrb[11].mxu0 }
0x1832   :  { %v1143_v18 = vpop.permute.xlu0 %1142 }
0x1833   :  { %1145 = vst.msk [vmem:[#allocation2 + $0x8] sm:$0xc0] %vm699_vm5, %v1143_v18 }
0x183a   :  { %v1147_v19 = vld [vmem:[#allocation2 + $0x8] sm:$0xff] }
0x183b   :  { %2294 = vmatmul.mubr.msk.f32.gmra.mrb[14].mxu1 %vm117_vm1, %v1147_v19 }
0x183c   :  { %2540 = vmatprep.mubr.msk.f32.mxu1 %vm2914_vm2, %v2912_v34 }
0x189d   :  { %v1228_v22 = vpop.f32.mrb[12].mxu1 }
0x189e   :  { %v1230_v23 = vpop.f32.mrb[13].mxu1  ;;  %v1244_v30 = vadd.f32 %v1243_v24, %v1228_v22 }
0x189f   :  { %v1669_v26 = vrot.slane %v1230_v23, 6  ;;  %v1776_v27 = vrot.slane %v1230_v23, 2 }
0x190e   :  { %v1234_v25 = vpop.f32.mrb[14].mxu1 }
0x190f   :  { %v1245_v28 = vadd.f32 %v1243_v24, %v1234_v25  ;;  %v1236_v29 = vpop.f32.mrb[15].mxu1 }
0x1910   :  { %v1247_v31 = vrot.slane %v1236_v29, 6  ;;  %v1345_v32 = vrot.slane %v1236_v29, 2 }
0x1911   :  { %v3240_v15 = vadd.f32 %v1776_v27, %v1245_v28  ;;  %v3242_v16 = vadd.f32 %v1669_v26, %v1245_v28 }
0x1912   :  { %v3244_v33 = vadd.f32 %v1345_v32, %v1244_v30  ;;  %v3246_v36 = vadd.f32 %v1247_v31, %v1244_v30 }
0x1914   :  { %v1320_v37 = vadd.f32 %v1316_v20, %v3246_v36 }
0x1916   :  { %2844 = vtanh.f32 %v1320_v37  ;;  %v2295_v39 = vmul.f32 -1.442695, %v1320_v37 }
0x1918   :  { %2846 = vpow2.f32 %v2295_v39 }
0x1920   :  { %v2845_v38 = vpop.eup %2844 }
0x1921   :  { %1330 = vrot.lane.b32.xlu1 %v2845_v38, %s2915_s2 }
0x1922   :  { %v2847_v40 = vpop.eup %2846 }
0x1923   :  { %v1324_v41 = vadd.f32 1.0, %v2847_v40 }
0x1925   :  { %2848 = vrcp.f32 %v1324_v41 }
0x192f   :  { %v2849_v42 = vpop.eup %2848 }
0x1930   :  { %v1328_v45 = vmul.f32 0.0, %v2849_v42 }
0x1993   :  { %v1331_v43 = vpop.permute.xlu1 %1330 }
0x1994   :  { %v1333_v44 = vmul.f32 %v2849_v42, %v1331_v43 }
0x1996   :  { %1335 = vrot.lane.b32.xlu0 %v1333_v44, %s2915_s2 }
0x1a08   :  { %v1336_v48 = vpop.permute.xlu0 %1335 }
0x1a09   :  { %v1338_v49 = vadd.f32 %v1336_v48, %v1328_v45 }
0x1a0b   :  { %2850 = vtanh.f32 %v1338_v49  ;;  %v1435_v0 = vrot.slane %v1338_v49, 6 }
0x1a15   :  { %v2851_v51 = vpop.eup %2850 }
0x1a16   :  { %1341 = vrot.lane.b32.xlu1 %v2851_v51, %s2915_s2 }
0x1a88   :  { %v1342_v14 = vpop.permute.xlu1 %1341 }
0x1a89   :  { %v1344_v52 = vmul.f32 %v2849_v42, %v1342_v14 }
0x1a8b   :  { %1349 = vrot.lane.b32.xlu0 %v1344_v52, %s2916_s17 }
0x1afd   :  { %v3253_v53 = vpop.permute.xlu0 %1349 }
0x1afe   :  { %2541 = vmatmul.mubr.msk.f32.vlgmr.msra.gmra.mrb[16].mxu1 %vm117_vm1, %v3253_v53 }
0x1aff   :  { %2731 = vmatpush3.bf16.msra.mxu1 %v3203_v6  ;;  %2562 = vmatprep.mubr.msk.f32.mxu1 %vm2914_vm2, %v2912_v34 }
0x1b00   :  { %2732 = vmatprep.subr.bf16.mxu1 %v2913_v47 }
0x1b03   :  { %2734 = vmatpush3.bf16.msra.mxu1 %v3213_v8 }
0x1b04   :  { %2741 = vmatprep.subr.bf16.mxu1 %v2913_v47 }
0x1bd1   :  { %v1419_v54 = vpop.f32.mrb[16].mxu1 }
0x1bd2   :  { %v1424_v55 = vrot.slane %v1419_v54, 6  ;;  %v2542_v57 = vpop.f32.mrb[17].mxu1 }
0x1bd4   :  { %v1426_v56 = vadd.f32 %v1424_v55, %v3244_v33 }
0x1bd6   :  { %2852 = vtanh.f32 %v1426_v56  ;;  %v2297_v58 = vmul.f32 -1.442695, %v1426_v56 }
0x1bd8   :  { %2854 = vpow2.f32 %v2297_v58 }
0x1be0   :  { %v2853_v35 = vpop.eup %2852 }
0x1be1   :  { %1439 = vrot.lane.b32.xlu1 %v2853_v35, %s2915_s2 }
0x1be2   :  { %v2855_v59 = vpop.eup %2854 }
0x1be3   :  { %v1430_v60 = vadd.f32 1.0, %v2855_v59 }
0x1be5   :  { %2856 = vrcp.f32 %v1430_v60 }
0x1bef   :  { %v2857_v61 = vpop.eup %2856 }
0x1bf0   :  { %v1437_v1 = vmul.f32 %v2857_v61, %v1435_v0 }
0x1c53   :  { %v1440_v62 = vpop.permute.xlu1 %1439 }
0x1c54   :  { %v1442_v63 = vmul.f32 %v2857_v61, %v1440_v62 }
0x1c56   :  { %1444 = vrot.lane.b32.xlu0 %v1442_v63, %s2915_s2 }
0x1cc8   :  { %v1445_v46 = vpop.permute.xlu0 %1444 }
0x1cc9   :  { %v1447_v2 = vadd.f32 %v1445_v46, %v1437_v1 }
0x1ccb   :  { %2858 = vtanh.f32 %v1447_v2  ;;  %v1542_v23 = vrot.slane %v1447_v2, 6 }
0x1cd5   :  { %v2859_v3 = vpop.eup %2858 }
0x1cd6   :  { %1450 = vrot.lane.b32.xlu1 %v2859_v3, %s2915_s2 }
0x1d48   :  { %v1451_v4 = vpop.permute.xlu1 %1450 }
0x1d49   :  { %v1453_v5 = vmul.f32 %v2857_v61, %v1451_v4 }
0x1d4b   :  { %v1455_v50 = vrot.slane %v1453_v5, 2 }
0x1d4d   :  { %1456 = vrot.lane.b32.xlu0 %v1455_v50, %s2916_s17 }
0x1dbf   :  { %v1457_v12 = vpop.permute.xlu0 %1456 }
0x1dc0   :  { %2552 = vmatmul.mubr.msk.f32.vlgmr.msra.gmra.mrb[12].mxu0 %vm117_vm1, %v1457_v12 }
0x1dc1   :  { %2737 = vmatpush3.bf16.msra.mxu0 %v3203_v6  ;;  %2573 = vmatprep.mubr.msk.f32.mxu0 %vm2914_vm2, %v2912_v34 }
0x1dc2   :  { %2738 = vmatprep.subr.bf16.mxu0 %v2913_v47 }
0x1dc5   :  { %2740 = vmatpush3.bf16.msra.mxu0 %v3213_v8 }
0x1dc6   :  { %2747 = vmatprep.subr.bf16.mxu0 %v2913_v47 }
0x1e93   :  { %v1526_v7 = vpop.f32.mrb[12].mxu0 }
0x1e94   :  { %v1531_v9 = vrot.slane %v1526_v7, 4  ;;  %v2553_v10 = vpop.f32.mrb[13].mxu0 }
0x1e96   :  { %v1533_v11 = vadd.f32 %v1531_v9, %v3246_v36 }
0x1e98   :  { %2860 = vtanh.f32 %v1533_v11  ;;  %v2299_v17 = vmul.f32 -1.442695, %v1533_v11 }
0x1e9a   :  { %2862 = vpow2.f32 %v2299_v17 }
0x1ea2   :  { %v2861_v13 = vpop.eup %2860 }
0x1ea3   :  { %1546 = vrot.lane.b32.xlu1 %v2861_v13, %s2915_s2 }
0x1ea4   :  { %v2863_v18 = vpop.eup %2862 }
0x1ea5   :  { %v1537_v19 = vadd.f32 1.0, %v2863_v18 }
0x1ea7   :  { %2864 = vrcp.f32 %v1537_v19 }
0x1eb1   :  { %v2865_v20 = vpop.eup %2864 }
0x1eb2   :  { %v1544_v24 = vmul.f32 %v2865_v20, %v1542_v23 }
0x1f15   :  { %v1547_v21 = vpop.permute.xlu1 %1546 }
0x1f16   :  { %v1549_v22 = vmul.f32 %v2865_v20, %v1547_v21 }
0x1f18   :  { %1551 = vrot.lane.b32.xlu0 %v1549_v22, %s2915_s2 }
0x1f8a   :  { %v1552_v25 = vpop.permute.xlu0 %1551 }
0x1f8b   :  { %v1554_v26 = vadd.f32 %v1552_v25, %v1544_v24 }
0x1f8d   :  { %2866 = vtanh.f32 %v1554_v26  ;;  %v1649_v48 = vrot.slane %v1554_v26, 6 }
0x1f97   :  { %v2867_v27 = vpop.eup %2866 }
0x1f98   :  { %1557 = vrot.lane.b32.xlu1 %v2867_v27, %s2915_s2 }
0x200a   :  { %v1558_v28 = vpop.permute.xlu1 %1557 }
0x200b   :  { %v1560_v29 = vmul.f32 %v2865_v20, %v1558_v28 }
0x200d   :  { %v1562_v30 = vrot.slane %v1560_v29, 4 }
0x200f   :  { %1563 = vrot.lane.b32.xlu0 %v1562_v30, %s2916_s17  ;;  %v2103_v30 = vld [vmem:[%s3374_s4 + $0x20] sm:$0xff] }
0x2081   :  { %v1564_v31 = vpop.permute.xlu0 %1563 }
0x2082   :  { %2563 = vmatmul.mubr.msk.f32.vlgmr.msra.gmra.mrb[18].mxu1 %vm117_vm1, %v1564_v31  ;;  %v2104_v31 = vld [vmem:[%s3374_s4 + $0x28] sm:$0xff] }
0x2083   :  { %2743 = vmatpush3.bf16.msra.mxu1 %v3203_v6  ;;  %2584 = vmatprep.mubr.msk.f32.mxu1 %vm2914_vm2, %v2912_v34 }
0x2084   :  { %2744 = vmatprep.subr.bf16.mxu1 %v2913_v47 }
0x2087   :  { %2746 = vmatpush3.bf16.msra.mxu1 %v3213_v8 }
0x2088   :  { %2753 = vmatprep.subr.bf16.mxu1 %v2913_v47 }
0x2155   :  { %v1633_v32 = vpop.f32.mrb[18].mxu1 }
0x2156   :  { %v1638_v36 = vrot.slane %v1633_v32, 2  ;;  %v2564_v37 = vpop.f32.mrb[19].mxu1  ;;  %v2760_v32 = vpack.c.bf16 %v2104_v31, %v2103_v30 }
0x2157   :  { %v2106_v37 = vld [vmem:[%s3374_s4 + $0x38] sm:$0xff] }
0x2158   :  { %v1640_v38 = vadd.f32 %v1638_v36, %v3244_v33  ;;  %v2105_v36 = vld [vmem:[%s3374_s4 + $0x30] sm:$0xff] }
0x215a   :  { %2868 = vtanh.f32 %v1640_v38  ;;  %v2301_v40 = vmul.f32 -1.442695, %v1640_v38 }
0x215c   :  { %2870 = vpow2.f32 %v2301_v40 }
0x2164   :  { %v2869_v39 = vpop.eup %2868 }
0x2165   :  { %1653 = vrot.lane.b32.xlu1 %v2869_v39, %s2915_s2  ;;  %v2763_v39 = vpack.c.bf16 %v2106_v37, %v2105_v36 }
0x2166   :  { %v2871_v41 = vpop.eup %2870 }
0x2167   :  { %v1644_v42 = vadd.f32 1.0, %v2871_v41 }
0x2169   :  { %2872 = vrcp.f32 %v1644_v42 }
0x2173   :  { %v2873_v43 = vpop.eup %2872 }
0x2174   :  { %v1651_v49 = vmul.f32 %v2873_v43, %v1649_v48 }
0x21d7   :  { %v1654_v44 = vpop.permute.xlu1 %1653 }
0x21d8   :  { %v1656_v45 = vmul.f32 %v2873_v43, %v1654_v44 }
0x21da   :  { %1658 = vrot.lane.b32.xlu0 %v1656_v45, %s2915_s2 }
0x224c   :  { %v1659_v51 = vpop.permute.xlu0 %1658 }
0x224d   :  { %v1661_v14 = vadd.f32 %v1659_v51, %v1651_v49 }
0x224f   :  { %2874 = vtanh.f32 %v1661_v14  ;;  %v1757_v46 = vrot.slane %v1661_v14, 6 }
0x2259   :  { %v2875_v33 = vpop.eup %2874 }
0x225a   :  { %1664 = vrot.lane.b32.xlu1 %v2875_v33, %s2915_s2 }
0x22cc   :  { %v1665_v52 = vpop.permute.xlu1 %1664 }
0x22cd   :  { %v1667_v54 = vmul.f32 %v2873_v43, %v1665_v52 }
0x22cf   :  { %v1673_v55 = vrot.slane %v1667_v54, 6 }
0x22d1   :  { %1674 = vrot.lane.b32.xlu0 %v1673_v55, %s2916_s17 }
0x2343   :  { %v1675_v57 = vpop.permute.xlu0 %1674 }
0x2344   :  { %2574 = vmatmul.mubr.msk.f32.vlgmr.msra.gmra.mrb[14].mxu0 %vm117_vm1, %v1675_v57 }
0x2345   :  { %2749 = vmatpush3.bf16.msra.mxu0 %v3203_v6  ;;  %2595 = vmatprep.mubr.msk.f32.mxu0 %vm2914_vm2, %v2912_v34 }
0x2346   :  { %2750 = vmatprep.subr.bf16.mxu0 %v2913_v47 }
0x2349   :  { %2752 = vmatpush3.bf16.msra.mxu0 %v3213_v8 }
0x234a   :  { %2759 = vmatprep.subr.bf16.mxu0 %v2913_v47 }
0x2417   :  { %v1744_v56 = vpop.f32.mrb[14].mxu0 }
0x2418   :  { %v1748_v35 = vadd.f32 %v1744_v56, %v3242_v16  ;;  %v2575_v58 = vpop.f32.mrb[15].mxu0 }
0x241a   :  { %2876 = vtanh.f32 %v1748_v35  ;;  %v2303_v60 = vmul.f32 -1.442695, %v1748_v35 }
0x241c   :  { %2878 = vpow2.f32 %v2303_v60 }
0x2424   :  { %v2877_v59 = vpop.eup %2876 }
0x2425   :  { %1761 = vrot.lane.b32.xlu1 %v2877_v59, %s2915_s2 }
0x2426   :  { %v2879_v61 = vpop.eup %2878 }
0x2427   :  { %v1752_v62 = vadd.f32 1.0, %v2879_v61 }
0x2429   :  { %2880 = vrcp.f32 %v1752_v62 }
0x2433   :  { %v2881_v63 = vpop.eup %2880 }
0x2434   :  { %v1759_v2 = vmul.f32 %v2881_v63, %v1757_v46 }
0x2497   :  { %v1762_v0 = vpop.permute.xlu1 %1761 }
0x2498   :  { %v1764_v1 = vmul.f32 %v2881_v63, %v1762_v0 }
0x249a   :  { %1766 = vrot.lane.b32.xlu0 %v1764_v1, %s2915_s2 }
0x250c   :  { %v1767_v3 = vpop.permute.xlu0 %1766 }
0x250d   :  { %v1769_v4 = vadd.f32 %v1767_v3, %v1759_v2 }
0x250f   :  { %2882 = vtanh.f32 %v1769_v4 }
0x2519   :  { %v2883_v5 = vpop.eup %2882 }
0x251a   :  { %1772 = vrot.lane.b32.xlu1 %v2883_v5, %s2915_s2 }
0x258c   :  { %v1773_v50 = vpop.permute.xlu1 %1772 }
0x258d   :  { %v1775_v12 = vmul.f32 %v2881_v63, %v1773_v50 }
0x258f   :  { %1780 = vrot.lane.b32.xlu0 %v1775_v12, %s2916_s17 }
0x2601   :  { %v1781_v7 = vpop.permute.xlu0 %1780 }
0x2602   :  { %2585 = vmatmul.mubr.msk.f32.vlgmr.msra.gmra.mrb[20].mxu1 %vm117_vm1, %v1781_v7 }
0x2603   :  { %2755 = vmatpush3.bf16.msra.mxu1 %v3203_v6  ;;  %2606 = vmatprep.mubr.msk.f32.mxu1 %vm2914_vm2, %v2912_v34 }
0x2604   :  { %2756 = vmatprep.subr.bf16.mxu1 %v2913_v47 }
0x2607   :  { %2758 = vmatpush3.bf16.msra.mxu1 %v3213_v8  ;;  %v1866_v8 = vrot.slane %v1769_v4, 6 }
0x2608   :  { %2765 = vmatprep.subr.bf16.mxu1 %v2913_v47 }
0x26d5   :  { %v1850_v9 = vpop.f32.mrb[20].mxu1 }
0x26d6   :  { %v1855_v10 = vrot.slane %v1850_v9, 6  ;;  %v2586_v11 = vpop.f32.mrb[21].mxu1 }
0x26d7   :  { %v2101_v11 = vld [vmem:[%s3374_s4 + $0x10] sm:$0xff] }
0x26d8   :  { %v1857_v13 = vadd.f32 %v1855_v10, %v3240_v15  ;;  %v2100_v10 = vld [vmem:[%s3374_s4 + $0x8] sm:$0xff] }
0x26da   :  { %2884 = vtanh.f32 %v1857_v13  ;;  %v2305_v18 = vmul.f32 -1.442695, %v1857_v13 }
0x26dc   :  { %2886 = vpow2.f32 %v2305_v18 }
0x26e4   :  { %v2885_v17 = vpop.eup %2884 }
0x26e5   :  { %1870 = vrot.lane.b32.xlu1 %v2885_v17, %s2915_s2  ;;  %v2102_v17 = vld [vmem:[%s3374_s4 + $0x18] sm:$0xff] }
0x26e6   :  { %v2887_v6 = vpop.eup %2886  ;;  %v2769_v18 = vpack.c.bf16 %v2102_v17, %v2101_v11 }
0x26e7   :  { %v1861_v19 = vadd.f32 1.0, %v2887_v6 }
0x26e9   :  { %2888 = vrcp.f32 %v1861_v19 }
0x26f3   :  { %v2889_v20 = vpop.eup %2888 }
0x26f4   :  { %v1868_v23 = vmul.f32 %v2889_v20, %v1866_v8 }
0x2757   :  { %v1871_v21 = vpop.permute.xlu1 %1870 }
0x2758   :  { %v1873_v22 = vmul.f32 %v2889_v20, %v1871_v21 }
0x275a   :  { %1875 = vrot.lane.b32.xlu0 %v1873_v22, %s2915_s2 }
0x27cc   :  { %v1876_v24 = vpop.permute.xlu0 %1875 }
0x27cd   :  { %v1878_v25 = vadd.f32 %v1876_v24, %v1868_v23  ;;  %v2312_v23 = vld [vmem:[%s3374_s4 + $0x40] ss:$0 sm:$0xff] }
0x27cf   :  { %2890 = vtanh.f32 %v1878_v25  ;;  %v1973_v54 = vrot.slane %v1878_v25, 6 }
0x27d9   :  { %v2891_v26 = vpop.eup %2890 }
0x27da   :  { %1881 = vrot.lane.b32.xlu1 %v2891_v26, %s2915_s2 }
0x284c   :  { %v1882_v27 = vpop.permute.xlu1 %1881 }
0x284d   :  { %v1884_v28 = vmul.f32 %v2889_v20, %v1882_v27 }
0x284f   :  { %v1886_v29 = vrot.slane %v1884_v28, 2 }
0x2851   :  { %1887 = vrot.lane.b32.xlu0 %v1886_v29, %s2916_s17 }
0x28c3   :  { %v1888_v38 = vpop.permute.xlu0 %1887 }
0x28c4   :  { %2596 = vmatmul.mubr.msk.f32.vlgmr.msra.gmra.mrb[16].mxu0 %vm117_vm1, %v1888_v38 }
0x28c5   :  { %2761 = vmatpush3.bf16.msra.mxu0 %v2760_v32  ;;  %2617 = vmatprep.mubr.msk.f32.mxu0 %vm2914_vm2, %v2912_v34 }
0x28c6   :  { %2762 = vmatprep.subr.bf16.mxu0 %v2913_v47 }
0x28c9   :  { %2764 = vmatpush3.bf16.msra.mxu0 %v2763_v39 }
0x28cc   :  { %2618 = vmatmul.mubr.msk.f32.vlgmr.msra.gmra.mrb[18].mxu0 %vm117_vm1, %v3253_v53 }
0x2997   :  { %v1957_v40 = vpop.f32.mrb[16].mxu0 }
0x2998   :  { %v1962_v41 = vrot.slane %v1957_v40, 4  ;;  %v2597_v42 = vpop.f32.mrb[17].mxu0 }
0x299a   :  { %v1964_v43 = vadd.f32 %v1962_v41, %v3242_v16 }
0x299c   :  { %2892 = vtanh.f32 %v1964_v43  ;;  %v2307_v49 = vmul.f32 -1.442695, %v1964_v43 }
0x299e   :  { %2894 = vpow2.f32 %v2307_v49 }
0x299f   :  { %v3335_v44 = vpop.f32.mrb[18].mxu0 }
0x29a0   :  { %v2619_v45 = vpop.f32.mrb[19].mxu0 }
0x29a6   :  { %v2893_v48 = vpop.eup %2892 }
0x29a7   :  { %1977 = vrot.lane.b32.xlu1 %v2893_v48, %s2915_s2 }
0x29a8   :  { %v2895_v51 = vpop.eup %2894 }
0x29a9   :  { %v1968_v14 = vadd.f32 1.0, %v2895_v51 }
0x29ab   :  { %2896 = vrcp.f32 %v1968_v14 }
0x29b5   :  { %v2897_v33 = vpop.eup %2896 }
0x29b6   :  { %v1975_v55 = vmul.f32 %v2897_v33, %v1973_v54 }
0x2a19   :  { %v1978_v52 = vpop.permute.xlu1 %1977 }
0x2a1a   :  { %v1980_v53 = vmul.f32 %v2897_v33, %v1978_v52 }
0x2a1c   :  { %1982 = vrot.lane.b32.xlu0 %v1980_v53, %s2915_s2 }
0x2a8e   :  { %v1983_v16 = vpop.permute.xlu0 %1982 }
0x2a8f   :  { %v1985_v57 = vadd.f32 %v1983_v16, %v1975_v55 }
0x2a91   :  { %2898 = vtanh.f32 %v1985_v57 }
0x2a9b   :  { %v2899_v56 = vpop.eup %2898 }
0x2a9c   :  { %1988 = vrot.lane.b32.xlu1 %v2899_v56, %s2915_s2 }
0x2b0e   :  { %v1989_v35 = vpop.permute.xlu1 %1988 }
0x2b0f   :  { %v1991_v58 = vmul.f32 %v2897_v33, %v1989_v35 }
0x2b11   :  { %v1993_v59 = vrot.slane %v1991_v58, 4 }
0x2b13   :  { %1994 = vrot.lane.b32.xlu0 %v1993_v59, %s2916_s17 }
0x2b85   :  { %v1995_v60 = vpop.permute.xlu0 %1994 }
0x2b86   :  { %2607 = vmatmul.mubr.msk.f32.vlgmr.msra.gmra.mrb[22].mxu1 %vm117_vm1, %v1995_v60 }
0x2b87   :  { %2628 = vmatprep.mubr.msk.f32.mxu1 %vm2914_vm2, %v2912_v34  ;;  %v2080_v34 = vrot.slane %v1985_v57, 6 }
0x2c59   :  { %v2064_v61 = vpop.f32.mrb[22].mxu1 }
0x2c5a   :  { %v2069_v62 = vrot.slane %v2064_v61, 2  ;;  %v2608_v63 = vpop.f32.mrb[23].mxu1 }
0x2c5c   :  { %v2071_v0 = vadd.f32 %v2069_v62, %v3240_v15  ;;  %v2099_v15 = vld [vmem:[%s3374_s4] sm:$0xff] }
0x2c5d   :  { %v2766_v13 = vpack.c.bf16 %v2100_v10, %v2099_v15 }
0x2c5e   :  { %2900 = vtanh.f32 %v2071_v0  ;;  %v2309_v46 = vmul.f32 -1.442695, %v2071_v0 }
0x2c5f   :  { %2767 = vmatpush3.bf16.msra.mxu1 %v2766_v13 }
0x2c60   :  { %2902 = vpow2.f32 %v2309_v46  ;;  %2768 = vmatprep.subr.bf16.mxu1 %v2913_v47 }
0x2c63   :  { %2770 = vmatpush3.bf16.msra.mxu1 %v2769_v18 }
0x2c68   :  { %v2901_v1 = vpop.eup %2900 }
0x2c69   :  { %2084 = vrot.lane.b32.xlu1 %v2901_v1, %s2915_s2 }
0x2c6a   :  { %v2903_v2 = vpop.eup %2902 }
0x2c6b   :  { %v2075_v3 = vadd.f32 1.0, %v2903_v2 }
0x2c6d   :  { %2904 = vrcp.f32 %v2075_v3 }
0x2c77   :  { %v2905_v4 = vpop.eup %2904 }
0x2c78   :  { %v2082_v12 = vmul.f32 %v2905_v4, %v2080_v34 }
0x2cdb   :  { %v2085_v5 = vpop.permute.xlu1 %2084 }
0x2cdc   :  { %v2087_v50 = vmul.f32 %v2905_v4, %v2085_v5 }
0x2cde   :  { %2089 = vrot.lane.b32.xlu0 %v2087_v50, %s2915_s2 }
0x2d50   :  { %v2090_v7 = vpop.permute.xlu0 %2089 }
0x2d51   :  { %v2092_v9 = vadd.f32 %v2090_v7, %v2082_v12 }
0x2d53   :  { %2906 = vtanh.f32 %v2092_v9 }
0x2d5d   :  { %v2907_v6 = vpop.eup %2906 }
0x2d5e   :  { %2095 = vrot.lane.b32.xlu1 %v2907_v6, %s2915_s2 }
0x2dd0   :  { %v2096_v19 = vpop.permute.xlu1 %2095 }
0x2dd1   :  { %v2098_v20 = vmul.f32 %v2905_v4, %v2096_v19 }
0x2dd3   :  { %v2178_v21 = vrot.slane %v2098_v20, 6 }
0x2dd5   :  { %2179 = vrot.lane.b32.xlu0 %v2178_v21, %s2916_s17 }
0x2e47   :  { %v2180_v22 = vpop.permute.xlu0 %2179 }
0x2e48   :  { %2629 = vmatmul.mubr.msk.f32.vlgmr.msra.gmra.mrb[24].mxu1 %vm117_vm1, %v2180_v22 }
0x2f1b   :  { %v2249_v8 = vpop.f32.mrb[24].mxu1 }
0x2f1c   :  { %v2250_v24 = vadd.f32 %v2249_v8, %v3335_v44  ;;  %v2630_v47 = vpop.f32.mrb[25].mxu1 }
0x2f1e   :  { %v2258_v25 = vadd.f32 %v2312_v23, %v2250_v24 }
0x2f20   :  { %v2313_v26 = vmul.f32 -1.442695, %v2258_v25 }
0x2f22   :  { %2908 = vpow2.f32 %v2313_v26 }
0x2f2c   :  { %v2909_v27 = vpop.eup %2908 }
0x2f2d   :  { %v2262_v28 = vadd.f32 1.0, %v2909_v27 }
0x2f2f   :  { %2910 = vrcp.f32 %v2262_v28 }
0x2f39   :  { %v2911_v29 = vpop.eup %2910 }
0x2f3a   :  { %2266 = vst.msk [vmem:[%s3375_s5] sm:$0x3] %vm2265_vm7, %v2911_v29 }

</bundles_post_ra>
